<compile_context>
chip_gen: v6e
topology: v6e:2x2x1
jax: 0.10.0
libtpu: 0.0.40
codegen_flags: <defaults>
</compile_context>

<pallas_src>
import functools
import math

import jax
import jax.numpy as jnp
from jax.experimental import pallas as pl
from jax.experimental.pallas import tpu as pltpu

LANE = 128                 # TPU lane width: feature dims padded to a multiple of this.
ROW_TILE = 512             # target output rows per grid step.
K_TILE = 2048              # target reduction-axis tile (columns of A).
PAD_MULT = 512             # node-count padding granularity (decoupled from tile size).
RESIDENT_B_BYTES = 16 << 20  # keep B fully VMEM-resident below this size.
NEG_SLOPE = 0.01           # nn.LeakyReLU default negative_slope.


def _round_up(x, m):
    return ((x + m - 1) // m) * m


def _pad2d(x, rows, cols):
    return jnp.pad(x, ((0, rows - x.shape[0]), (0, cols - x.shape[1])))


def _pick_tile(extent, target, mult):
    """Largest multiple of `mult` that divides `extent` and is <= target."""
    best = mult
    d = mult
    cap = min(target, extent)
    while d <= cap:
        if extent % d == 0:
            best = d
        d += mult
    return best


# ---------------------------------------------------------------------------
# Fused layer kernel:  out = act((A @ B) @ W + bias)     (W / bias / act optional)
# grid = (M // tm, K // tk); rows "parallel", reduction axis last + "arbitrary".
# ---------------------------------------------------------------------------
def _gcn_layer_kernel(*refs, tk, resident_b, has_w, has_bias, apply_act,
                      negative_slope):
    # refs layout: a, b, [w], [bias], out, acc
    a_ref, b_ref = refs[0], refs[1]
    pos = 2
    w_ref = bias_ref = None
    if has_w:
        w_ref = refs[pos]; pos += 1
    if has_bias:
        bias_ref = refs[pos]; pos += 1
    out_ref, acc_ref = refs[pos], refs[pos + 1]

    k = pl.program_id(1)

    @pl.when(k == 0)
    def _():
        acc_ref[...] = jnp.zeros_like(acc_ref)

    if resident_b:
        # B is fully VMEM-resident; slice the current K-chunk in place.
        off = pl.multiple_of(k * tk, tk)
        b_tile = b_ref[pl.ds(off, tk), :]
    else:
        b_tile = b_ref[...]

    acc_ref[...] += jnp.dot(a_ref[...], b_tile,
                            preferred_element_type=jnp.float32)

    @pl.when(k == pl.num_programs(1) - 1)
    def _():
        h = acc_ref[...]
        if has_w:
            # Small epilogue matmul (tm x f_in x f_out): negligible MXU work, kills
            # the HBM write+readback of the (N, f_in) intermediate.
            h = jnp.dot(h.astype(w_ref.dtype), w_ref[...],
                        preferred_element_type=jnp.float32)
        if has_bias:
            h = h + bias_ref[...].astype(jnp.float32)
        if apply_act:
            h = jnp.where(h > 0, h, negative_slope * h)
        out_ref[...] = h.astype(out_ref.dtype)


def fused_matmul(a, b, w=None, bias=None, *, tm, tk, apply_act=False,
                 negative_slope=NEG_SLOPE, out_dtype=jnp.bfloat16):
    """out = act((a @ b) @ w + bias), tiled over (rows of a) x (reduction K)."""
    m, k = a.shape
    k2, n = b.shape
    assert k == k2 and m % tm == 0 and k % tk == 0 and n % LANE == 0
    n_out = n if w is None else w.shape[1]
    if w is not None:
        assert w.shape[0] == n and n_out % LANE == 0

    resident_b = k * n * b.dtype.itemsize <= RESIDENT_B_BYTES

    inputs = [a, b]
    in_specs = [
        pl.BlockSpec((tm, tk), lambda i, kk: (i, kk)),            # A: streamed tiles
        pl.BlockSpec((k, n), lambda i, kk: (0, 0)) if resident_b  # B: VMEM-resident
        else pl.BlockSpec((tk, n), lambda i, kk: (kk, 0)),        # B: streamed tiles
    ]
    if w is not None:
        inputs.append(w)
        in_specs.append(pl.BlockSpec(w.shape, lambda i, kk: (0, 0)))
    if bias is not None:
        inputs.append(bias)
        in_specs.append(pl.BlockSpec((1, n_out), lambda i, kk: (0, 0)))

    kernel = functools.partial(
        _gcn_layer_kernel, tk=tk, resident_b=resident_b,
        has_w=w is not None, has_bias=bias is not None,
        apply_act=apply_act, negative_slope=negative_slope)

    # VMEM footprint estimate -> explicit scoped limit, capped for v7x (64 MiB / TC).
    est = 2 * tm * tk * a.dtype.itemsize                          # A double buffer
    est += (k * n if resident_b else 2 * tk * n) * b.dtype.itemsize
    if w is not None:
        est += 2 * w.size * w.dtype.itemsize
    if bias is not None:
        est += 2 * bias.size * bias.dtype.itemsize
    est += tm * n * 4                                              # f32 accumulator
    est += 2 * tm * n_out * jnp.dtype(out_dtype).itemsize          # output double buffer
    vmem_limit = int(min(max(32 << 20, 2 * est), 48 << 20))

    return pl.pallas_call(
        kernel,
        out_shape=jax.ShapeDtypeStruct((m, n_out), out_dtype),
        grid_spec=pltpu.PrefetchScalarGridSpec(
            num_scalar_prefetch=0,
            grid=(m // tm, k // tk),
            in_specs=in_specs,
            out_specs=pl.BlockSpec((tm, n_out), lambda i, kk: (i, 0)),
            scratch_shapes=[pltpu.VMEM((tm, n), jnp.float32)],
        ),
        compiler_params=pltpu.CompilerParams(
            dimension_semantics=("parallel", "arbitrary"),
            vmem_limit_bytes=vmem_limit,
        ),
    )(*inputs)


# ---------------------------------------------------------------------------
# Graph preprocessing / params (plain-JAX glue)
# ---------------------------------------------------------------------------
def build_normalized_adjacency(edge_index, num_nodes, n_pad, dtype=jnp.bfloat16):
    """Dense D^{-1/2} (A + I) D^{-1/2} matching PyG GCNConv (add_self_loops=True).

    A[dst, src] counts edges src -> dst (duplicate edges sum); D = in-degree + 1.
    Built edge-wise directly into a padded bf16 buffer (no dense f32 intermediate).
    """
    src, dst = edge_index[0], edge_index[1]
    deg = jnp.ones((num_nodes,), jnp.float32).at[dst].add(1.0)       # in-degree + self loop
    d_inv_sqrt = jnp.where(deg > 0, jax.lax.rsqrt(deg), 0.0)
    edge_val = (d_inv_sqrt[dst] * d_inv_sqrt[src]).astype(dtype)
    diag_val = (d_inv_sqrt * d_inv_sqrt).astype(dtype)
    diag = jnp.arange(num_nodes)
    adj = jnp.zeros((n_pad, n_pad), dtype)
    adj = adj.at[dst, src].add(edge_val)
    adj = adj.at[diag, diag].add(diag_val)
    return adj


def init_gcn_params(key, num_layers, input_dim, hidden_dim):
    """Glorot-uniform weights + zero biases (PyG GCNConv defaults)."""
    params = []
    dims = [input_dim] + [hidden_dim] * num_layers
    for layer in range(num_layers):
        f_in, f_out = dims[layer], dims[layer + 1]
        key, wkey = jax.random.split(key)
        limit = math.sqrt(6.0 / (f_in + f_out))
        w = jax.random.uniform(wkey, (f_in, f_out), jnp.float32, -limit, limit)
        b = jnp.zeros((1, f_out), jnp.float32)
        params.append((w, b))
    return params


def gcn_forward(x, edge_index, params):
    """Forward matching GCN.forward (dropout is not applied in the reference forward)."""
    num_nodes, input_dim = x.shape
    num_layers = len(params)

    n_pad = _round_up(num_nodes, PAD_MULT)
    tm = _pick_tile(n_pad, ROW_TILE, 8)
    tk = _pick_tile(n_pad, K_TILE, LANE)
    # v7x has 2 TensorCores: keep >= 2 tiles on the "parallel" row axis when possible.
    while n_pad // tm < 2 and tm > 256 and tm % 16 == 0:
        tm //= 2

    a_norm = build_normalized_adjacency(edge_index, num_nodes, n_pad)

    # Activations live in bf16 between layers; feature dims padded to 128 for
    # lane-dense MXU work and unmasked stores. Zero padding is exact (extra rows/cols
    # of A, X, W, b are zero and LeakyReLU(0) == 0).
    h = _pad2d(x, n_pad, _round_up(input_dim, LANE)).astype(jnp.bfloat16)

    f_out = input_dim
    for i, (w, b) in enumerate(params):
        f_in, f_out = w.shape
        f_in_p = _round_up(f_in, LANE)
        f_out_p = _round_up(f_out, LANE)
        w_p = _pad2d(w, f_in_p, f_out_p).astype(jnp.bfloat16)
        b_p = _pad2d(b.reshape(1, -1), 1, f_out_p)            # stays f32
        is_last = i == num_layers - 1
        act = not is_last
        out_dtype = jnp.float32 if is_last else jnp.bfloat16

        if f_in <= f_out:
            # Single fused call: act((A @ H) @ W + b). The N^2 adjacency matmul runs at
            # the narrower width f_in and the (N, f_in) intermediate never touches HBM.
            h = fused_matmul(a_norm, h, w=w_p, bias=b_p, tm=tm, tk=tk,
                             apply_act=act, out_dtype=out_dtype)
        else:
            # Keep the smaller width f_out inside the N^2 matmul: XW first, then A @ XW.
            tk_w = _pick_tile(f_in_p, K_TILE, LANE)
            xw = fused_matmul(h, w_p, tm=tm, tk=tk_w)
            h = fused_matmul(a_norm, xw, bias=b_p, tm=tm, tk=tk,
                             apply_act=act, out_dtype=out_dtype)

    return h[:num_nodes, :f_out]


if __name__ == "__main__":
    # Small deterministic example: 16 nodes, input_dim=8, hidden_dim=32, 2 layers.
    num_nodes = 16
    num_layers = 2
    input_dim = 8
    hidden_dim = 32

    key = jax.random.PRNGKey(0)
    key, xkey = jax.random.split(key)
    x = jax.random.normal(xkey, (num_nodes, input_dim), jnp.float32)

    # Undirected ring graph (both directions listed), plus a couple of chords.
    nodes = jnp.arange(num_nodes)
    src = jnp.concatenate([nodes, (nodes + 1) % num_nodes, jnp.array([0, 8, 3, 11])])
    dst = jnp.concatenate([(nodes + 1) % num_nodes, nodes, jnp.array([8, 0, 11, 3])])
    edge_index = jnp.stack([src, dst]).astype(jnp.int32)

    params = init_gcn_params(key, num_layers, input_dim, hidden_dim)

    out = jax.block_until_ready(gcn_forward(x, edge_index, params))
    assert out.shape == (num_nodes, hidden_dim)
    assert bool(jnp.all(jnp.isfinite(out)))

    # Pure-JAX f32 reference (same PyG-matching semantics) for a sanity check.
    def reference(x, edge_index, params):
        s, d = edge_index[0], edge_index[1]
        adj = jnp.zeros((num_nodes, num_nodes), jnp.float32).at[d, s].add(1.0)
        adj = adj + jnp.eye(num_nodes, dtype=jnp.float32)
        deg = adj.sum(axis=1)
        dis = jnp.where(deg > 0, jax.lax.rsqrt(deg), 0.0)
        a = dis[:, None] * adj * dis[None, :]
        h = x
        for i, (w, bb) in enumerate(params):
            h = a @ (h @ w) + bb
            if i != len(params) - 1:
                h = jnp.where(h > 0, h, NEG_SLOPE * h)
        return h

    ref = reference(x, edge_index, params)
    max_err = float(jnp.max(jnp.abs(out - ref)))
    assert bool(jnp.allclose(out, ref, rtol=5e-2, atol=5e-2)), max_err
    print("KERNEL_OK")
</pallas_src>

<mosaic_0001>
module attributes {stable_mosaic.version = 11 : i64} {
  func.func @_gcn_layer_kernel(%arg0: i32, %arg1: i32, %arg2: memref<256x512xbf16, #tpu.memory_space<vmem>>, %arg3: memref<512x128xbf16, #tpu.memory_space<vmem>>, %arg4: memref<128x128xbf16, #tpu.memory_space<vmem>>, %arg5: memref<1x128xf32, #tpu.memory_space<vmem>>, %arg6: memref<256x128xbf16, #tpu.memory_space<vmem>>, %arg7: memref<256x128xf32, #tpu.memory_space<vmem>>) attributes {dimension_semantics = [#tpu.dimension_semantics<parallel>, #tpu.dimension_semantics<arbitrary>], iteration_bounds = array<i64: 2, 1>, scalar_prefetch = 0 : i64, scratch_operands = 1 : i64, tpu.core_type = #tpu.core_type<tc>, window_params = [{transform_indices = @transform_0, window_bounds = array<i64: 256, 512>}, {pipeline_mode = #tpu.pipeline_mode<synchronous>, transform_indices = @transform_1, window_bounds = array<i64: 512, 128>}, {pipeline_mode = #tpu.pipeline_mode<synchronous>, transform_indices = @transform_2, window_bounds = array<i64: 128, 128>}, {pipeline_mode = #tpu.pipeline_mode<synchronous>, transform_indices = @transform_3, window_bounds = array<i64: 1, 128>}, {transform_indices = @transform_4, window_bounds = array<i64: 256, 128>}]} {
    %c0_i32 = arith.constant 0 : i32
    %0 = arith.cmpi eq, %arg1, %c0_i32 : i32
    %1 = arith.extui %0 : i1 to i32
    %c0_i32_0 = arith.constant 0 : i32
    %2 = arith.cmpi ne, %1, %c0_i32_0 : i32
    scf.if %2 {
      %cst_9 = arith.constant 0.000000e+00 : f32
      %15 = vector.broadcast %cst_9 : f32 to vector<256x128xf32>
      %c0_10 = arith.constant 0 : index
      %c0_11 = arith.constant 0 : index
      %16 = vector.load %arg7[%c0_10, %c0_11] : memref<256x128xf32, #tpu.memory_space<vmem>>, vector<256x128xf32>
      tpu.vector_store %arg7[%c0_10, %c0_11], %15 {strides = array<i32>} : memref<256x128xf32, #tpu.memory_space<vmem>>, vector<256x128xf32>,
    } else {
    }
    %c512_i32 = arith.constant 512 : i32
    %3 = arith.muli %arg1, %c512_i32 : i32
    %4 = tpu.assume_multiple %3, 512 : i32
    %5 = arith.index_cast %4 : i32 to index
    %c0 = arith.constant 0 : index
    %6 = vector.load %arg3[%5, %c0] : memref<512x128xbf16, #tpu.memory_space<vmem>>, vector<512x128xbf16>
    %c0_1 = arith.constant 0 : index
    %c0_2 = arith.constant 0 : index
    %7 = vector.load %arg7[%c0_1, %c0_2] : memref<256x128xf32, #tpu.memory_space<vmem>>, vector<256x128xf32>
    %c0_3 = arith.constant 0 : index
    %c0_4 = arith.constant 0 : index
    %8 = vector.load %arg2[%c0_3, %c0_4] : memref<256x512xbf16, #tpu.memory_space<vmem>>, vector<256x512xbf16>
    %cst = arith.constant dense<0.000000e+00> : vector<256x128xf32>
    %9 = tpu.matmul %8, %6, %cst {dimension_numbers = #tpu.dot_dimension_numbers<[1], [0], [0], [1], [0, 0, 1, 1], [], []>} : vector<256x512xbf16>, vector<512x128xbf16>, vector<256x128xf32> -> vector<256x128xf32>
    %10 = arith.addf %7, %9 : vector<256x128xf32>
    %c0_5 = arith.constant 0 : index
    %c0_6 = arith.constant 0 : index
    %11 = vector.load %arg7[%c0_5, %c0_6] : memref<256x128xf32, #tpu.memory_space<vmem>>, vector<256x128xf32>
    tpu.vector_store %arg7[%c0_5, %c0_6], %10 {strides = array<i32>} : memref<256x128xf32, #tpu.memory_space<vmem>>, vector<256x128xf32>,
    %c0_i32_7 = arith.constant 0 : i32
    %12 = arith.cmpi eq, %arg1, %c0_i32_7 : i32
    %13 = arith.extui %12 : i1 to i32
    %c0_i32_8 = arith.constant 0 : i32
    %14 = arith.cmpi ne, %13, %c0_i32_8 : i32
    scf.if %14 {
      %c0_9 = arith.constant 0 : index
      %c0_10 = arith.constant 0 : index
      %15 = vector.load %arg7[%c0_9, %c0_10] : memref<256x128xf32, #tpu.memory_space<vmem>>, vector<256x128xf32>
      %16 = arith.truncf %15 : vector<256x128xf32> to vector<256x128xbf16>
      %c0_11 = arith.constant 0 : index
      %c0_12 = arith.constant 0 : index
      %17 = vector.load %arg4[%c0_11, %c0_12] : memref<128x128xbf16, #tpu.memory_space<vmem>>, vector<128x128xbf16>
      %cst_13 = arith.constant dense<0.000000e+00> : vector<256x128xf32>
      %18 = tpu.matmul %16, %17, %cst_13 {dimension_numbers = #tpu.dot_dimension_numbers<[1], [0], [0], [1], [0, 0, 1, 1], [], []>} : vector<256x128xbf16>, vector<128x128xbf16>, vector<256x128xf32> -> vector<256x128xf32>
      %c0_14 = arith.constant 0 : index
      %c0_15 = arith.constant 0 : index
      %19 = vector.load %arg5[%c0_14, %c0_15] : memref<1x128xf32, #tpu.memory_space<vmem>>, vector<1x128xf32>
      %20 = vector.broadcast %19 : vector<1x128xf32> to vector<256x128xf32>
      %21 = arith.addf %18, %20 : vector<256x128xf32>
      %cst_16 = arith.constant 0.000000e+00 : f32
      %22 = vector.broadcast %cst_16 : f32 to vector<256x128xf32>
      %23 = arith.cmpf ogt, %21, %22 : vector<256x128xf32>
      %cst_17 = arith.constant 0.00999999977 : f32
      %24 = vector.broadcast %cst_17 : f32 to vector<256x128xf32>
      %25 = arith.mulf %24, %21 : vector<256x128xf32>
      %26 = arith.select %23, %21, %25 : vector<256x128xi1>, vector<256x128xf32>
      %27 = arith.truncf %26 : vector<256x128xf32> to vector<256x128xbf16>
      %c0_18 = arith.constant 0 : index
      %c0_19 = arith.constant 0 : index
      %28 = vector.load %arg6[%c0_18, %c0_19] : memref<256x128xbf16, #tpu.memory_space<vmem>>, vector<256x128xbf16>
      tpu.vector_store %arg6[%c0_18, %c0_19], %27 {strides = array<i32>} : memref<256x128xbf16, #tpu.memory_space<vmem>>, vector<256x128xbf16>,
    } else {
    }
    return
  }
  func.func @transform_0(%arg0: i32, %arg1: i32) -> (i32, i32) {
    %c0_i32 = arith.constant 0 : i32
    return %arg0, %arg1 : i32, i32
  }
  func.func @transform_1(%arg0: i32, %arg1: i32) -> (i32, i32) {
    %c0_i32 = arith.constant 0 : i32
    %c0_i32_0 = arith.constant 0 : i32
    %c0_i32_1 = arith.constant 0 : i32
    return %c0_i32, %c0_i32_0 : i32, i32
  }
  func.func @transform_2(%arg0: i32, %arg1: i32) -> (i32, i32) {
    %c0_i32 = arith.constant 0 : i32
    %c0_i32_0 = arith.constant 0 : i32
    %c0_i32_1 = arith.constant 0 : i32
    return %c0_i32, %c0_i32_0 : i32, i32
  }
  func.func @transform_3(%arg0: i32, %arg1: i32) -> (i32, i32) {
    %c0_i32 = arith.constant 0 : i32
    %c0_i32_0 = arith.constant 0 : i32
    %c0_i32_1 = arith.constant 0 : i32
    return %c0_i32, %c0_i32_0 : i32, i32
  }
  func.func @transform_4(%arg0: i32, %arg1: i32) -> (i32, i32) {
    %c0_i32 = arith.constant 0 : i32
    %c0_i32_0 = arith.constant 0 : i32
    return %arg0, %c0_i32 : i32, i32
  }
}

</mosaic_0001>

<bundles_post_ra>
// kernel: tpu_custom_call.1
= control target key start
LH: loop header
LB: loop body
LE: loop exit
PB: predicated region body
PF: predicated region fallthrough
CT: control target
= control target key end

     0   :  { %9 = vsyncpa [#allocation4], 0  ;;  %s3383_s0 = inlined_call_operand.hbm [shape: bf16[512,512], index: 0, kind: input, shape index: {}]   ;;  %s3384_s1 = inlined_call_operand.hbm [shape: bf16[512,128], index: 1, kind: input, shape index: {}]   ;;  %s3385_s2 = inlined_call_operand.hbm [shape: bf16[128,128], index: 2, kind: input, shape index: {}]   ;;  %s3386_s3 = inlined_call_operand.vmem [shape: f32[1,128], index: 3, kind: input, shape index: {}]   ;;  %s3387_s4 = inlined_call_operand.hbm [shape: bf16[512,128], index: 4, kind: output, shape index: {}]  }
   0x1   :  { %11 = vsyncpa [#allocation4 + $0x1], 0 }
   0x2   :  { %12 = vsyncpa [#allocation7], 0 }
   0x3   :  { %13 = vsyncpa [#allocation5], 0 }
   0x4   :  { %15 = vsyncpa [#allocation5 + $0x1], 0  ;;  %s3048_s15 = smov 0   ;;  %s3050_s16 = smov 0  }
   0x5   :  { %s3052_s17 = smov 0   ;;  %s3054_s18 = smov 0  }
   0x6   :  { %s3056_s19 = smov 0   ;;  %s3058_s20 = smov 0  }
   0x7 LB: > { %s2023_s21 = sadd.s32 4294967295, %s3011_s20   ;;  %s2024_s22 = sadd.s32 4294967294, %s3011_s20   ;;  %s3011_s20 = sphi %s3058_s20, %s21_s20   ;;  %s3007_s19 = sphi %s3056_s19, %s3407_s19   ;;  %s3003_s18 = sphi %s3054_s18, %s3406_s18   ;;  %s2999_s17 = sphi %s3052_s17, %s3405_s17   ;;  %s2995_s16 = sphi %s3050_s16, %s3404_s16   ;;  %s2991_s15 = sphi %s3048_s15, %s3403_s15  }
   0x8   : > { %p55_p0 = scmp.ne.s32.totalorder %s2995_s16, %s2991_s15  ;;  %p3082_p1 = scmp.eq.s32.totalorder %s2023_s21, 0 }
   0x9   : > { %p3086_p2 = scmp.eq.s32.totalorder %s2023_s21, 1  ;;  %p148_p3 = scmp.eq.s32.totalorder %s2024_s22, 1 }
   0xa   : > { %s3391_s23 = scalar_select %p3082_p1, 1, 0 }
   0xb   : > { %p3092_p4 = por %p3082_p1, %p55_p0  ;;  %p2025_p5 = scmp.ge.s32.totalorder %s3011_s20, 1 }
   0xc   : > { %p3097_p6 = por %p148_p3, %p55_p0  ;;  %p155_p7 = scmp.lt.s32.totalorder %s3011_s20, 3 }
   0xd   : > { %s3393_s25 = scalar_select %p3092_p4, 1, 0 }
   0xe   : > { %s3394_s26 = scalar_select %p3097_p6, 1, 0 }
   0xf   : > { %p3102_p8 = pnand %p2025_p5, %p155_p7  ;;  %s3013_s28 = smov [#allocation6]  }
  0x10   : > { %s167_s29 = sshll.u32 %s3013_s28, 4  ;;  %s3014_s5 = smov [#allocation8]   ;;  %s168_s29 = int_to_ptr.vmem [resolvable:$true] %s167_s29 }
  0x11   : > { %p2634_p9 = pneg %p3102_p8  ;;  %s180_s6 = sshll.u32 %s3014_s5, 4  ;;  %s181_s6 = int_to_ptr.vmem [resolvable:$true] %s180_s6 }
  0x12   : > { %s2858_s7 = scalar_lea.vmem %s168_s29, 4096  ;;  %p2866_p5 = scmp.lt.s32.totalorder %s168_s29, %s168_s29 }
  0x13   : > { %p3111_p11 = pnand %p2634_p9, %p3082_p1  ;;  %p2859_p13 = scmp.ne.s32.totalorder %s168_s29, %s2858_s7 }
  0x14   : > { %p2867_p7 = scmp.lt.s32.totalorder %s2858_s7, %s2858_s7 }
  0x15   : > { %p2849_p12 = pneg %p3111_p11 }
  0x16   : > { %p2868_p10 = por %p2867_p7, %p2866_p5 }
  0x17   : > { %p2861_p0 = pnand %p2859_p13, %p2849_p12 }
  0x19   : > { %p2862_p3 = pneg %p2861_p0 }
  0x1b   : > { %p2869_p9 = pnand %p2868_p10, %p2862_p3 }
  0x1d   : > { %2872 = shalt.err (!%p2869_p9)
}
  0x1e   : > { %s3015_s8 = smov 64   ;;  %s3016_s9 = smov 4  }
  0x1f   : > { %2637 = dma.hbm_to_vmem [thread:$0]  (!%p3111_p11), %s3384_s1, 4096, %s168_s29, [#allocation7], %s3015_s8, %s3015_s8, %s3016_s9  }
  0x20   : > { %s2884_s12 = scalar_lea.vmem %s181_s6, 1024  ;;  %p2892_p1 = scmp.lt.s32.totalorder %s181_s6, %s181_s6 }
  0x21   : > { %p2885_p6 = scmp.ne.s32.totalorder %s181_s6, %s2884_s12  ;;  %p2893_p4 = scmp.lt.s32.totalorder %s2884_s12, %s2884_s12 }
  0x23   : > { %p2887_p13 = pnand %p2885_p6, %p2849_p12  ;;  %p2894_p5 = por %p2893_p4, %p2892_p1 }
  0x25   : > { %p2888_p0 = pneg %p2887_p13 }
  0x27   : > { %p2895_p10 = pnand %p2894_p5, %p2888_p0 }
  0x29   : > { %2898 = shalt.err (!%p2895_p10)
}
  0x2a   : > { %2640 = dma.hbm_to_vmem [thread:$0]  (!%p3111_p11), %s3385_s2, 1024, %s181_s6, [#allocation7], %s3015_s8, %s3015_s8, %s3016_s9  }
  0x2b   : > { %s33_s21 = sadd.s32 1, %s3007_s19  ;;  %s42_s22 = sadd.s32 1, %s2999_s17 }
  0x2c   : > { %p35_p1 = scmp.ge.s32.totalorder %s33_s21, 2  ;;  %p49_p4 = scmp.ne.s32.totalorder %s2999_s17, %s2995_s16 }
  0x2d   : > { %p50_p6 = scmp.eq.s32.totalorder %s3011_s20, 0  ;;  %p2651_p12 = scmp.lt.s32.totalorder %s3011_s20, 2 }
  0x2e   : > { %s3409_s21 = smov (%p35_p1, %s33_s21), 0  ;;  %p3143_p7 = por %p3086_p2, %p49_p4 }
  0x2f   : > { %p51_p3 = por %p50_p6, %p49_p4  ;;  %s37_s29 = ssub.s32 %s3007_s19, %s3409_s21 }
  0x30   : > { %s197_s30 = sand.u32 1, %s2999_s17   ;;  %p40_p9 = scmp.eq.s32.totalorder %s37_s29, 0 }
  0x31   : > { %s2029_s5 = sshll.u32 %s197_s30, 9  ;;  %s2181_s6 = sshll.u32 %s3007_s19, 13 }
  0x32   : > { %s3152_s7 = scalar_select %p40_p9, %s2999_s17, %s42_s22  }
  0x33   : > { %s210_s10 = scalar_lea.hbm %s3383_s0, %s2181_s6  ;;  %s201_s11 = scalar_lea.vmem [#allocation3], %s2029_s5 }
  0x34   : > { %s211_s12 = sshll.u32 %s201_s11, 4  ;;  %p3159_p11 = pnand %p2651_p12, %p51_p3  ;;  %s212_s12 = int_to_ptr.vmem [resolvable:$true] %s211_s12 }
  0x35   : > { %s198_s13 = scalar_lea.sflag [#allocation4], %s197_s30  ;;  %s2912_s14 = scalar_lea.vmem %s212_s12, 8192 }
  0x36   : > { %p2901_p2 = pneg %p3159_p11  ;;  %p2913_p13 = scmp.ne.s32.totalorder %s212_s12, %s2912_s14 }
  0x37   : > { %s3017_s22 = smov [#allocation3]  }
  0x38   : > { %p2915_p0 = pnand %p2913_p13, %p2901_p2  ;;  %s2917_s29 = sshll.u32 %s3017_s22, 4  ;;  %s2918_s29 = int_to_ptr.vmem [resolvable:$false] %s2917_s29 }
  0x39   : > { %s2919_s6 = scalar_lea.vmem %s2918_s29, 16384  ;;  %p2920_p10 = scmp.lt.s32.totalorder %s212_s12, %s2918_s29 }
  0x3a   : > { %p2916_p5 = pneg %p2915_p0  ;;  %p2921_p1 = scmp.lt.s32.totalorder %s2919_s6, %s2912_s14 }
  0x3c   : > { %p2922_p4 = por %p2921_p1, %p2920_p10 }
  0x3e   : > { %p2923_p6 = pnand %p2922_p4, %p2916_p5 }
  0x40   : > { %2926 = shalt.err (!%p2923_p6)
}
  0x41   : > { %s3018_s5 = smov 256   ;;  %s3019_s8 = smov 16  }
  0x42   : > { %2644 = dma.hbm_to_vmem [thread:$0]  (!%p3159_p11), %s210_s10, 8192, %s212_s12, %s198_s13, %s3018_s5, %s3018_s5, %s3019_s8  }
  0x43   : > { %223 = sbr.rel (%p3102_p8) target bundleno = 686 (0x2ae), region = 36  ;;  %s3170_s30 = sand.u32 (!%p3102_p8), 1, %s2995_s16  }
  0x44   : > { %s2034_s9 = sshll.u32 (!%p3102_p8), %s3170_s30, 9  ;;  %s226_s11 = scalar_lea.sflag (!%p3102_p8), [#allocation4], %s3170_s30 }
  0x45   : > { %s3174_s14 = scalar_lea.vmem (!%p3102_p8), [#allocation3], %s2034_s9  ;;  %p3399_p12 = scmp.ne.s32.totalorder (!%p3102_p8), %s3393_s25, 0 }
  0x48   : > { %2978 = dma.done.wait (%p3399_p12), %s226_s11, 8192  }
  0x49   : > { %2980 = vsyncadd (%p3399_p12), %s226_s11, 4294959104  ;;  %p3400_p3 = scmp.ne.s32.totalorder %s3391_s23, 0 }
  0x4b   : > { %2982 = dma.done.wait (%p3400_p3), [#allocation7], 5120  }
  0x4c   : > { %2984 = vsyncadd (%p3400_p3), [#allocation7], 4294962176  ;;  %v2711_v0 = vld [vmem:[#allocation6 + $0x78] sm:$0xff]   ;;  %v2713_v2 = vld [vmem:[#allocation6 + $0x70] sm:$0xff]   ;;  %s2037_s27 = sshll.u32 %s3170_s30, 7  ;;  %s2214_s12 = sshll.u32 %s3003_s18, 11 }
  0x4d   : > { %v2712_v1 = vld [vmem:[#allocation6 + $0x38] sm:$0xff]   ;;  %2606 = vmatprep.subr.bf16.mxu1 %v2711_v0  ;;  %2310 = vmatprep.subr.bf16.mxu0 %v2711_v0  ;;  %v2714_v3 = vld [vmem:[#allocation6 + $0x30] sm:$0xff]   ;;  %v2715_v4 = vld [vmem:[#allocation6 + $0x68] sm:$0xff]   ;;  %s3282_s10 = scalar_lea.vmem [#allocation9], %s2037_s27  ;;  %s3331_s29 = scalar_lea.hbm %s3387_s4, %s2214_s12 }
  0x4e   : > { %2614 = vmatpush3.bf16.msra.mxu1 %v2712_v1  ;;  %2311 = vmatpush3.bf16.msra.mxu0 %v2712_v1  ;;  %v2716_v5 = vld [vmem:[#allocation6 + $0x28] sm:$0xff]   ;;  %v2717_v6 = vld [vmem:[#allocation6 + $0x60] sm:$0xff]   ;;  %v2719_v8 = vld [vmem:[#allocation6 + $0x58] sm:$0xff]   ;;  %s1918_s24 = sshll.u32 %s3282_s10, 4  ;;  %s1905_s18 = scalar_lea.sflag [#allocation5], %s3170_s30  ;;  %s3333_s24 = int_to_ptr.vmem [resolvable:$true] %s1918_s24 }
  0x4f   : > { %2607 = vmatprep.subr.bf16.mxu1 %v2713_v2  ;;  %2312 = vmatprep.subr.bf16.mxu0 %v2713_v2  ;;  %v2718_v7 = vld [vmem:[#allocation6 + $0x20] sm:$0xff]   ;;  %v2720_v9 = vld [vmem:[#allocation6 + $0x18] sm:$0xff]   ;;  %v2721_v10 = vld [vmem:[#allocation6 + $0x50] sm:$0xff]   ;;  %s2927_s6 = scalar_lea.vmem %s3333_s24, 2048  ;;  %s3020_s5 = smov [#allocation9]  }
  0x50   : > { %v2729_v11 = vld [vmem:[%s3174_s14 + $0x184] ss:$16 sps:$4 sm:$0xff]   ;;  %v2723_v13 = vld [vmem:[#allocation6 + $0x48] sm:$0xff]   ;;  %v2730_v17 = vld [vmem:[#allocation6 + $0xf8] sm:$0xff]   ;;  %p2928_p8 = scmp.ne.s32.totalorder %s3333_s24, %s2927_s6  ;;  %s2931_s8 = sshll.u32 %s3020_s5, 4  ;;  %s2932_s8 = int_to_ptr.vmem [resolvable:$false] %s2931_s8 }
  0x51   : > { %v2722_v12 = vld [vmem:[#allocation6 + $0x10] sm:$0xff]   ;;  %1107 = vmatprep.mubr.bf16.mxu1 %v2729_v11  ;;  %v2724_v14 = vld [vmem:[#allocation6 + $0x8] sm:$0xff]   ;;  %v2725_v15 = vld [vmem:[#allocation6 + $0x40] sm:$0xff]   ;;  %s2933_s9 = scalar_lea.vmem %s2932_s8, 4096  ;;  %p2934_p2 = scmp.lt.s32.totalorder %s3333_s24, %s2932_s8 }
  0x52   : > { %2615 = vmatpush3.bf16.msra.mxu1 %v2714_v3  ;;  %2313 = vmatpush3.bf16.msra.mxu0 %v2714_v3  ;;  %v2726_v16 = vld [vmem:[#allocation6] sm:$0xff]   ;;  %v2731_v19 = vld [vmem:[#allocation6 + $0xb8] sm:$0xff]   ;;  %v2732_v21 = vld [vmem:[#allocation6 + $0xf0] sm:$0xff]   ;;  %p2929_p9 = pnand %p2928_p8, %p3143_p7  ;;  %p2935_p13 = scmp.lt.s32.totalorder %s2933_s9, %s2927_s6 }
  0x53   : > { %2608 = vmatprep.subr.bf16.mxu1 %v2715_v4  ;;  %2314 = vmatprep.subr.bf16.mxu0 %v2715_v4  ;;  %v2727_v18 = vld [vmem:[%s3174_s14 + $0x180] ss:$16 sps:$4 sm:$0xff]   ;;  %v2734_v20 = vld [vmem:[%s3174_s14 + $0x1a4] ss:$16 sps:$4 sm:$0xff]   ;;  %v2737_v24 = vld [vmem:[#allocation6 + $0xe8] sm:$0xff]  }
  0x54   : > { %v2733_v22 = vld [vmem:[#allocation6 + $0xb0] sm:$0xff]   ;;  %v2738_v25 = vld [vmem:[#allocation6 + $0xa8] sm:$0xff]   ;;  %v2739_v28 = vld [vmem:[#allocation6 + $0xe0] sm:$0xff]   ;;  %p2930_p11 = pneg %p2929_p9  ;;  %p2936_p0 = por %p2935_p13, %p2934_p2 }
  0x55   : > { %v2736_v23 = vld [vmem:[%s3174_s14 + $0x1a0] ss:$16 sps:$4 sm:$0xff]   ;;  %v2757_v27 = vld [vmem:[%s3174_s14 + $0x4] ss:$16 sps:$4 sm:$0xff]   ;;  %v2744_v33 = vld [vmem:[#allocation6 + $0xd8] sm:$0xff]  }
  0x56   : > { %2616 = vmatpush3.bf16.msra.mxu1 %v2716_v5  ;;  %2315 = vmatpush3.bf16.msra.mxu0 %v2716_v5  ;;  %v2755_v26 = vld [vmem:[%s3174_s14] ss:$16 sps:$4 sm:$0xff]   ;;  %v2741_v29 = vld [vmem:[%s3174_s14 + $0x1c4] ss:$16 sps:$4 sm:$0xff]   ;;  %v2745_v36 = vld [vmem:[#allocation6 + $0x98] sm:$0xff]   ;;  %p2937_p5 = pnand %p2936_p0, %p2930_p11 }
  0x57   : > { %2609 = vmatprep.subr.bf16.mxu1 %v2717_v6  ;;  %2316 = vmatprep.subr.bf16.mxu0 %v2717_v6  ;;  %v2761_v30 = vld [vmem:[%s3174_s14 + $0x24] ss:$16 sps:$4 sm:$0xff]   ;;  %v2743_v32 = vld [vmem:[%s3174_s14 + $0x1c0] ss:$16 sps:$4 sm:$0xff]   ;;  %v2751_v41 = vld [vmem:[#allocation6 + $0xc8] sm:$0xff]  }
  0x58   : > { %1011 = vmatprep.mubr.bf16.mxu0 %v2757_v27  ;;  %v2740_v31 = vld [vmem:[#allocation6 + $0xa0] sm:$0xff]   ;;  %v2746_v38 = vld [vmem:[#allocation6 + $0xd0] sm:$0xff]   ;;  %v2752_v44 = vld [vmem:[#allocation6 + $0x88] sm:$0xff]  }
  0x59   : > { %v2765_v34 = vld [vmem:[%s3174_s14 + $0x20] ss:$16 sps:$4 sm:$0xff]   ;;  %v2767_v35 = vld [vmem:[%s3174_s14 + $0x44] ss:$16 sps:$4 sm:$0xff]   ;;  %v2760_v45 = vld [vmem:[%s3174_s14 + $0xc] ss:$16 sps:$4 sm:$0xff]  }
  0x5a   : > { %2617 = vmatpush3.bf16.msra.mxu1 %v2718_v7  ;;  %2317 = vmatpush3.bf16.msra.mxu0 %v2718_v7  ;;  %v2748_v37 = vld [vmem:[%s3174_s14 + $0x1e4] ss:$16 sps:$4 sm:$0xff]   ;;  %v2750_v40 = vld [vmem:[%s3174_s14 + $0x1e0] ss:$16 sps:$4 sm:$0xff]   ;;  %v2758_v48 = vld [vmem:[%s3174_s14 + $0x8] ss:$16 sps:$4 sm:$0xff]  }
  0x5b   : > { %2610 = vmatprep.subr.bf16.mxu1 %v2719_v8  ;;  %2318 = vmatprep.subr.bf16.mxu0 %v2719_v8  ;;  %v2747_v39 = vld [vmem:[#allocation6 + $0x90] sm:$0xff]   ;;  %v2753_v46 = vld [vmem:[#allocation6 + $0xc0] sm:$0xff]   ;;  %v2763_v51 = vld [vmem:[%s3174_s14 + $0x2c] ss:$16 sps:$4 sm:$0xff]  }
  0x5c   : > { %v2771_v42 = vld [vmem:[%s3174_s14 + $0x40] ss:$16 sps:$4 sm:$0xff]   ;;  %v2773_v43 = vld [vmem:[%s3174_s14 + $0x64] ss:$16 sps:$4 sm:$0xff]   ;;  %v2766_v53 = vld [vmem:[%s3174_s14 + $0x28] ss:$16 sps:$4 sm:$0xff]  }
  0x5d   : > { %v2754_v47 = vld [vmem:[#allocation6 + $0x80] sm:$0xff]   ;;  %v2769_v55 = vld [vmem:[%s3174_s14 + $0x4c] ss:$16 sps:$4 sm:$0xff]   ;;  %v2772_v57 = vld [vmem:[%s3174_s14 + $0x48] ss:$16 sps:$4 sm:$0xff]  }
  0x5e   : > { %2618 = vmatpush3.bf16.msra.mxu1 %v2720_v9  ;;  %2319 = vmatpush3.bf16.msra.mxu0 %v2720_v9  ;;  %v2777_v49 = vld [vmem:[%s3174_s14 + $0x60] ss:$16 sps:$4 sm:$0xff]   ;;  %v2779_v50 = vld [vmem:[%s3174_s14 + $0x84] ss:$16 sps:$4 sm:$0xff]   ;;  %v2775_v59 = vld [vmem:[%s3174_s14 + $0x6c] ss:$16 sps:$4 sm:$0xff]  }
  0x5f   : > { %2611 = vmatprep.subr.bf16.mxu1 %v2721_v10  ;;  %2320 = vmatprep.subr.bf16.mxu0 %v2721_v10  ;;  %v2783_v52 = vld [vmem:[%s3174_s14 + $0x80] ss:$16 sps:$4 sm:$0xff]   ;;  %v2785_v54 = vld [vmem:[%s3174_s14 + $0xa4] ss:$16 sps:$4 sm:$0xff]   ;;  %v2778_v61 = vld [vmem:[%s3174_s14 + $0x68] ss:$16 sps:$4 sm:$0xff]  }
  0x60   : > { %v2789_v56 = vld [vmem:[%s3174_s14 + $0xa0] ss:$16 sps:$4 sm:$0xff]   ;;  %v2791_v58 = vld [vmem:[%s3174_s14 + $0xc4] ss:$16 sps:$4 sm:$0xff]   ;;  %v2781_v63 = vld [vmem:[%s3174_s14 + $0x8c] ss:$16 sps:$4 sm:$0xff]  }
  0x61   : > { %v2795_v60 = vld [vmem:[%s3174_s14 + $0xc0] ss:$16 sps:$4 sm:$0xff]   ;;  %v2797_v62 = vld [vmem:[%s3174_s14 + $0xe4] ss:$16 sps:$4 sm:$0xff]   ;;  %v2784_v1 = vld [vmem:[%s3174_s14 + $0x88] ss:$16 sps:$4 sm:$0xff]  }
  0x62   : > { %2619 = vmatpush3.bf16.msra.mxu1 %v2722_v12  ;;  %2321 = vmatpush3.bf16.msra.mxu0 %v2722_v12  ;;  %v2801_v0 = vld [vmem:[%s3174_s14 + $0xe0] ss:$16 sps:$4 sm:$0xff]   ;;  %v2803_v2 = vld [vmem:[%s3174_s14 + $0x104] ss:$16 sps:$4 sm:$0xff]   ;;  %v2787_v3 = vld [vmem:[%s3174_s14 + $0xac] ss:$16 sps:$4 sm:$0xff]  }
  0x63   : > { %2612 = vmatprep.subr.bf16.mxu1 %v2723_v13  ;;  %2322 = vmatprep.subr.bf16.mxu0 %v2723_v13  ;;  %v2807_v4 = vld [vmem:[%s3174_s14 + $0x100] ss:$16 sps:$4 sm:$0xff]   ;;  %v2790_v5 = vld [vmem:[%s3174_s14 + $0xa8] ss:$16 sps:$4 sm:$0xff]   ;;  %v2809_v6 = vld [vmem:[%s3174_s14 + $0x124] ss:$16 sps:$4 sm:$0xff]  }
  0x64   : > { %v2793_v7 = vld [vmem:[%s3174_s14 + $0xcc] ss:$16 sps:$4 sm:$0xff]   ;;  %v2813_v8 = vld [vmem:[%s3174_s14 + $0x120] ss:$16 sps:$4 sm:$0xff]   ;;  %v2796_v9 = vld [vmem:[%s3174_s14 + $0xc8] ss:$16 sps:$4 sm:$0xff]  }
  0x65   : > { %v2815_v10 = vld [vmem:[%s3174_s14 + $0x144] ss:$16 sps:$4 sm:$0xff]   ;;  %v2839_v11 = vld [vmem:[#allocation8 + $0x38] sm:$0xff]   ;;  %v2819_v13 = vld [vmem:[%s3174_s14 + $0x140] ss:$16 sps:$4 sm:$0xff]  }
  0x66   : > { %2620 = vmatpush3.bf16.msra.mxu1 %v2724_v14  ;;  %2323 = vmatpush3.bf16.msra.mxu0 %v2724_v14  ;;  %v2799_v12 = vld [vmem:[%s3174_s14 + $0xec] ss:$16 sps:$4 sm:$0xff]   ;;  %v2802_v14 = vld [vmem:[%s3174_s14 + $0xe8] ss:$16 sps:$4 sm:$0xff]  }
  0x67   : > { %2613 = vmatprep.subr.bf16.mxu1 %v2725_v15  ;;  %2324 = vmatprep.subr.bf16.mxu0 %v2725_v15  ;;  %v2821_v15 = vld [vmem:[%s3174_s14 + $0x164] ss:$16 sps:$4 sm:$0xff]   ;;  %v2845_v27 = vld [vmem:[#allocation8 + $0x8] sm:$0xff]  }
  0x6a   : > { %2621 = vmatpush3.bf16.msra.mxu1 %v2726_v16  ;;  %2325 = vmatpush3.bf16.msra.mxu0 %v2726_v16  ;;  %v2805_v16 = vld [vmem:[%s3174_s14 + $0x10c] ss:$16 sps:$4 sm:$0xff]  }
  0x6b   : > { %2422 = vmatprep.subr.bf16.mxu1 %v2730_v17  ;;  %2558 = vmatprep.subr.bf16.mxu0 %v2839_v11  ;;  %v2840_v17 = vld [vmem:[#allocation8 + $0x30] sm:$0xff]  }
  0x6d   : > { %1108 = vmatmul.mubr.bf16.vlgmr.msra.gmra.mxu1 %v2727_v18  ;;  %1012 = vmatmul.mubr.bf16.vlgmr.msra.gmra.mxu0 %v2755_v26  ;;  %v2825_v18 = vld [vmem:[%s3174_s14 + $0x160] ss:$16 sps:$4 sm:$0xff]  }
  0x6e   : > { %2423 = vmatpush3.bf16.msra.mxu1 %v2731_v19  ;;  %1115 = vmatprep.mubr.bf16.mxu1 %v2734_v20  ;;  %v2841_v19 = vld [vmem:[#allocation8 + $0x28] sm:$0xff]   ;;  %v2844_v26 = vld [vmem:[#allocation8 + $0x10] sm:$0xff]  }
  0x6f   : > { %2424 = vmatprep.subr.bf16.mxu1 %v2732_v21  ;;  %1019 = vmatprep.mubr.bf16.mxu0 %v2761_v30  ;;  %v2808_v20 = vld [vmem:[%s3174_s14 + $0x108] ss:$16 sps:$4 sm:$0xff]   ;;  %v2811_v21 = vld [vmem:[%s3174_s14 + $0x12c] ss:$16 sps:$4 sm:$0xff]   ;;  %v2846_v30 = vld [vmem:[#allocation8] sm:$0xff]  }
  0x70   : > { %2559 = vmatpush3.bf16.msra.mxu0 %v2839_v11 }
  0x71   : > { %2560 = vmatprep.subr.bf16.mxu0 %v2840_v17 }
  0x72   : > { %2425 = vmatpush3.bf16.msra.mxu1 %v2733_v22  ;;  %v2842_v22 = vld [vmem:[#allocation8 + $0x20] sm:$0xff]  }
  0x73   : > { %2426 = vmatprep.subr.bf16.mxu1 %v2737_v24  ;;  %v2814_v24 = vld [vmem:[%s3174_s14 + $0x128] ss:$16 sps:$4 sm:$0xff]  }
  0x74   : > { %2561 = vmatpush3.bf16.msra.mxu0 %v2840_v17 }
  0x75   : > { %1116 = vmatmul.mubr.bf16.gmra.mxu1 %v2736_v23  ;;  %1020 = vmatmul.mubr.bf16.gmra.mxu0 %v2765_v34  ;;  %v2843_v23 = vld [vmem:[#allocation8 + $0x18] sm:$0xff]  }
  0x76   : > { %2427 = vmatpush3.bf16.msra.mxu1 %v2738_v25  ;;  %1123 = vmatprep.mubr.bf16.mxu1 %v2741_v29  ;;  %v2817_v25 = vld [vmem:[%s3174_s14 + $0x14c] ss:$16 sps:$4 sm:$0xff]  }
  0x77   : > { %2428 = vmatprep.subr.bf16.mxu1 %v2739_v28  ;;  %1027 = vmatprep.mubr.bf16.mxu0 %v2767_v35  ;;  %v2820_v28 = vld [vmem:[%s3174_s14 + $0x148] ss:$16 sps:$4 sm:$0xff]   ;;  %v2823_v29 = vld [vmem:[%s3174_s14 + $0x16c] ss:$16 sps:$4 sm:$0xff]  }
  0x78   : > { %2562 = vmatprep.subr.bf16.mxu0 %v2841_v19  ;;  %v2830_v34 = vld [vmem:[%s3174_s14 + $0x1ac] ss:$16 sps:$4 sm:$0xff]   ;;  %v2832_v35 = vld [vmem:[%s3174_s14 + $0x1a8] ss:$16 sps:$4 sm:$0xff]  }
  0x79   : > { %2563 = vmatpush3.bf16.msra.mxu0 %v2841_v19 }
  0x7a   : > { %2429 = vmatpush3.bf16.msra.mxu1 %v2740_v31  ;;  %2564 = vmatprep.subr.bf16.mxu0 %v2842_v22  ;;  %v2826_v31 = vld [vmem:[%s3174_s14 + $0x168] ss:$16 sps:$4 sm:$0xff]  }
  0x7b   : > { %2430 = vmatprep.subr.bf16.mxu1 %v2744_v33  ;;  %v2829_v33 = vld [vmem:[%s3174_s14 + $0x188] ss:$16 sps:$4 sm:$0xff]  }
  0x7d   : > { %1124 = vmatmul.mubr.bf16.gmra.mxu1 %v2743_v32  ;;  %1028 = vmatmul.mubr.bf16.gmra.mxu0 %v2771_v42  ;;  %v2827_v32 = vld [vmem:[%s3174_s14 + $0x18c] ss:$16 sps:$4 sm:$0xff]  }
  0x7e   : > { %2431 = vmatpush3.bf16.msra.mxu1 %v2745_v36  ;;  %1131 = vmatprep.mubr.bf16.mxu1 %v2748_v37  ;;  %v2833_v36 = vld [vmem:[%s3174_s14 + $0x1cc] ss:$16 sps:$4 sm:$0xff]   ;;  %v2835_v37 = vld [vmem:[%s3174_s14 + $0x1c8] ss:$16 sps:$4 sm:$0xff]  }
  0x7f   : > { %2432 = vmatprep.subr.bf16.mxu1 %v2746_v38  ;;  %1035 = vmatprep.mubr.bf16.mxu0 %v2773_v43  ;;  %v2836_v38 = vld [vmem:[%s3174_s14 + $0x1ec] ss:$16 sps:$4 sm:$0xff]  }
  0x80   : > { %2565 = vmatpush3.bf16.msra.mxu0 %v2842_v22 }
  0x81   : > { %2566 = vmatprep.subr.bf16.mxu0 %v2843_v23 }
  0x82   : > { %2433 = vmatpush3.bf16.msra.mxu1 %v2747_v39  ;;  %v2838_v39 = vld [vmem:[%s3174_s14 + $0x1e8] ss:$16 sps:$4 sm:$0xff]  }
  0x83   : > { %2434 = vmatprep.subr.bf16.mxu1 %v2751_v41 }
  0x84   : > { %2567 = vmatpush3.bf16.msra.mxu0 %v2843_v23 }
  0x85   : > { %1132 = vmatmul.mubr.bf16.gmra.mxu1 %v2750_v40  ;;  %1036 = vmatmul.mubr.bf16.gmra.mxu0 %v2777_v49 }
  0x86   : > { %2435 = vmatpush3.bf16.msra.mxu1 %v2752_v44  ;;  %1172 = vmatprep.mubr.bf16.mxu1 %v2760_v45 }
  0x87   : > { %2436 = vmatprep.subr.bf16.mxu1 %v2753_v46  ;;  %1043 = vmatprep.mubr.bf16.mxu0 %v2779_v50 }
  0x88   : > { %2568 = vmatprep.subr.bf16.mxu0 %v2844_v26 }
  0x89   : > { %2569 = vmatpush3.bf16.msra.mxu0 %v2844_v26 }
  0x8a   : > { %2437 = vmatpush3.bf16.msra.mxu1 %v2754_v47  ;;  %2570 = vmatprep.subr.bf16.mxu0 %v2845_v27 }
  0x8d   : > { %1173 = vmatmul.mubr.bf16.vlgmr.msra.gmra.mxu1 %v2758_v48  ;;  %1044 = vmatmul.mubr.bf16.gmra.mxu0 %v2783_v52 }
  0x8e   : > { %1180 = vmatprep.mubr.bf16.mxu1 %v2763_v51  ;;  %1051 = vmatprep.mubr.bf16.mxu0 %v2785_v54 }
  0x8f   : > { %2571 = vmatpush3.bf16.msra.mxu0 %v2845_v27 }
  0x90   : > { %2572 = vmatprep.subr.bf16.mxu0 %v2846_v30 }
  0x93   : > { %2573 = vmatpush3.bf16.msra.mxu0 %v2846_v30 }
  0x95   : > { %1181 = vmatmul.mubr.bf16.gmra.mxu1 %v2766_v53  ;;  %1052 = vmatmul.mubr.bf16.gmra.mxu0 %v2789_v56 }
  0x96   : > { %1188 = vmatprep.mubr.bf16.mxu1 %v2769_v55  ;;  %1059 = vmatprep.mubr.bf16.mxu0 %v2791_v58 }
  0x9d   : > { %1189 = vmatmul.mubr.bf16.gmra.mxu1 %v2772_v57  ;;  %1060 = vmatmul.mubr.bf16.gmra.mxu0 %v2795_v60 }
  0x9e   : > { %1196 = vmatprep.mubr.bf16.mxu1 %v2775_v59  ;;  %1067 = vmatprep.mubr.bf16.mxu0 %v2797_v62 }
  0xa5   : > { %1197 = vmatmul.mubr.bf16.gmra.mxu1 %v2778_v61  ;;  %1068 = vmatmul.mubr.bf16.gmra.mxu0 %v2801_v0 }
  0xa6   : > { %1204 = vmatprep.mubr.bf16.mxu1 %v2781_v63  ;;  %1075 = vmatprep.mubr.bf16.mxu0 %v2803_v2 }
  0xad   : > { %1205 = vmatmul.mubr.bf16.gmra.mxu1 %v2784_v1  ;;  %1076 = vmatmul.mubr.bf16.gmra.mxu0 %v2807_v4 }
  0xae   : > { %1212 = vmatprep.mubr.bf16.mxu1 %v2787_v3  ;;  %1083 = vmatprep.mubr.bf16.mxu0 %v2809_v6 }
  0xb5   : > { %1213 = vmatmul.mubr.bf16.gmra.mxu1 %v2790_v5  ;;  %1084 = vmatmul.mubr.bf16.gmra.mxu0 %v2813_v8 }
  0xb6   : > { %1220 = vmatprep.mubr.bf16.mxu1 %v2793_v7  ;;  %1091 = vmatprep.mubr.bf16.mxu0 %v2815_v10 }
  0xbd   : > { %1221 = vmatmul.mubr.bf16.gmra.mxu1 %v2796_v9  ;;  %1092 = vmatmul.mubr.bf16.gmra.mxu0 %v2819_v13 }
  0xbe   : > { %1228 = vmatprep.mubr.bf16.mxu1 %v2799_v12  ;;  %1099 = vmatprep.mubr.bf16.mxu0 %v2821_v15 }
  0xc5   : > { %1229 = vmatmul.mubr.bf16.gmra.mxu1 %v2802_v14  ;;  %1100 = vmatmul.mubr.bf16.gmra.mxu0 %v2825_v18 }
  0xc6   : > { %1236 = vmatprep.mubr.bf16.mxu1 %v2805_v16 }
  0xcd   : > { %1237 = vmatmul.mubr.bf16.gmra.mxu1 %v2808_v20 }
  0xce   : > { %1244 = vmatprep.mubr.bf16.mxu1 %v2811_v21 }
  0xd5   : > { %1245 = vmatmul.mubr.bf16.gmra.mxu1 %v2814_v24 }
  0xd6   : > { %1252 = vmatprep.mubr.bf16.mxu1 %v2817_v25 }
  0xdd   : > { %1253 = vmatmul.mubr.bf16.gmra.mxu1 %v2820_v28 }
  0xde   : > { %1260 = vmatprep.mubr.bf16.mxu1 %v2823_v29 }
  0xe5   : > { %1261 = vmatmul.mubr.bf16.gmra.mxu1 %v2826_v31 }
  0xe6   : > { %1268 = vmatprep.mubr.bf16.mxu1 %v2827_v32 }
  0xed   : > { %1269 = vmatmul.mubr.bf16.gmra.mxu1 %v2829_v33 }
  0xee   : > { %1276 = vmatprep.mubr.bf16.mxu1 %v2830_v34 }
  0xf5   : > { %1277 = vmatmul.mubr.bf16.gmra.mxu1 %v2832_v35 }
  0xf6   : > { %1284 = vmatprep.mubr.bf16.mxu1 %v2833_v36 }
  0xfd   : > { %1285 = vmatmul.mubr.bf16.gmra.mxu1 %v2835_v37 }
  0xfe   : > { %1292 = vmatprep.mubr.bf16.mxu1 %v2836_v38 }
 0x105   : > { %1293 = vmatmul.mubr.bf16.gmra.mxu1 %v2838_v39 }
 0x12d   : > { %v2398_v40 = vpop.f32.mrf.mxu1  ;;  %v2326_v46 = vpop.f32.mrf.mxu0 }
 0x12f   : > { %v2399_v41 = vpop.f32.mrf.mxu1  ;;  %v2327_v48 = vpop.f32.mrf.mxu0 }
 0x130   : > { %v3248_v42 = vadd.f32 %v2399_v41, %v2398_v40  ;;  %v2328_v18 = vadd.f32 %v2327_v48, %v2326_v46 }
 0x131   : > { %v2401_v43 = vpop.f32.mrf.mxu1  ;;  %v2329_v51 = vpop.f32.mrf.mxu0 }
 0x133   : > { %v2402_v44 = vpop.f32.mrf.mxu1  ;;  %v2330_v53 = vpop.f32.mrf.mxu0 }
 0x134   : > { %v3250_v45 = vadd.f32 %v2402_v44, %v2401_v43  ;;  %v2331_v20 = vadd.f32 %v2330_v53, %v2329_v51 }
 0x135   : > { %v2404_v47 = vpop.f32.mrf.mxu1  ;;  %v2332_v56 = vpop.f32.mrf.mxu0 }
 0x137   : > { %v2405_v49 = vpop.f32.mrf.mxu1  ;;  %v2333_v58 = vpop.f32.mrf.mxu0 }
 0x138   : > { %v3252_v50 = vadd.f32 %v2405_v49, %v2404_v47  ;;  %v2334_v33 = vadd.f32 %v2333_v58, %v2332_v56 }
 0x139   : > { %v2407_v52 = vpop.f32.mrf.mxu1  ;;  %v2335_v61 = vpop.f32.mrf.mxu0 }
 0x13b   : > { %v2408_v54 = vpop.f32.mrf.mxu1  ;;  %v2336_v63 = vpop.f32.mrf.mxu0 }
 0x13c   : > { %v3254_v55 = vadd.f32 %v2408_v54, %v2407_v52  ;;  %v2337_v35 = vadd.f32 %v2336_v63, %v2335_v61 }
 0x13d   : > { %v2410_v57 = vpop.f32.mrf.mxu1  ;;  %v2338_v2 = vpop.f32.mrf.mxu0 }
 0x13f   : > { %v2411_v59 = vpop.f32.mrf.mxu1  ;;  %v2339_v4 = vpop.f32.mrf.mxu0 }
 0x140   : > { %v3256_v60 = vadd.f32 %v2411_v59, %v2410_v57  ;;  %v2340_v51 = vadd.f32 %v2339_v4, %v2338_v2 }
 0x141   : > { %v2413_v62 = vpop.f32.mrf.mxu1  ;;  %v2341_v7 = vpop.f32.mrf.mxu0 }
 0x143   : > { %v2414_v0 = vpop.f32.mrf.mxu1  ;;  %v2342_v9 = vpop.f32.mrf.mxu0 }
 0x144   : > { %v3258_v1 = vadd.f32 %v2414_v0, %v2413_v62  ;;  %v2343_v53 = vadd.f32 %v2342_v9, %v2341_v7 }
 0x145   : > { %v2416_v3 = vpop.f32.mrf.mxu1  ;;  %v2344_v12 = vpop.f32.mrf.mxu0 }
 0x147   : > { %v2417_v5 = vpop.f32.mrf.mxu1  ;;  %v2345_v14 = vpop.f32.mrf.mxu0 }
 0x148   : > { %v3260_v6 = vadd.f32 %v2417_v5, %v2416_v3 }
 0x149   : > { %v2419_v8 = vpop.f32.mrf.mxu1  ;;  %v2347_v16 = vpop.f32.mrf.mxu0 }
 0x14b   : > { %v2420_v10 = vpop.f32.mrf.mxu1  ;;  %v2348_v21 = vpop.f32.mrf.mxu0 }
 0x14c   : > { %v3262_v11 = vadd.f32 %v2420_v10, %v2419_v8  ;;  %v2346_v10 = vadd.f32 %v2345_v14, %v2344_v12 }
 0x14d   : > { %v2438_v13 = vpop.f32.mrf.mxu1  ;;  %v2350_v24 = vpop.f32.mrf.mxu0 }
 0x14f   : > { %v2439_v15 = vpop.f32.mrf.mxu1  ;;  %v2351_v28 = vpop.f32.mrf.mxu0 }
 0x150   : > { %v2440_v19 = vadd.f32 %v2439_v15, %v2438_v13  ;;  %v2349_v15 = vadd.f32 %v2348_v21, %v2347_v16 }
 0x151   : > { %v2441_v17 = vpop.f32.mrf.mxu1  ;;  %v2353_v31 = vpop.f32.mrf.mxu0 }
 0x152   : > { %v1175_v26 = vadd.f32 %v2440_v19, %v2328_v18 }
 0x153   : > { %v2442_v22 = vpop.f32.mrf.mxu1  ;;  %v2354_v36 = vpop.f32.mrf.mxu0 }
 0x154   : > { %v2443_v23 = vadd.f32 %v2442_v22, %v2441_v17 }
 0x155   : > { %v2444_v25 = vpop.f32.mrf.mxu1  ;;  %v2356_v39 = vpop.f32.mrf.mxu0 }
 0x156   : > { %v1178_v27 = vadd.f32 %v2443_v23, %v2331_v20 }
 0x157   : > { %v2445_v29 = vpop.f32.mrf.mxu1  ;;  %v2357_v44 = vpop.f32.mrf.mxu0 }
 0x158   : > { %v1400_v30 = vpack.c.bf16 %v1178_v27, %v1175_v26  ;;  %v2446_v34 = vadd.f32 %v2445_v29, %v2444_v25  ;;  %v2352_v27 = vadd.f32 %v2351_v28, %v2350_v24 }
 0x159   : > { %v2447_v32 = vpop.f32.mrf.mxu1  ;;  %v2359_v48 = vpop.f32.mrf.mxu0 }
 0x15a   : > { %2574 = vmatprep.mubr.bf16.mxu0 %v1400_v30  ;;  %v1183_v41 = vadd.f32 %v2446_v34, %v2334_v33  ;;  %v2355_v30 = vadd.f32 %v2354_v36, %v2353_v31 }
 0x15b   : > { %v2448_v37 = vpop.f32.mrf.mxu1  ;;  %v2360_v54 = vpop.f32.mrf.mxu0 }
 0x15c   : > { %v2449_v38 = vadd.f32 %v2448_v37, %v2447_v32 }
 0x15d   : > { %v2450_v40 = vpop.f32.mrf.mxu1  ;;  %v2362_v58 = vpop.f32.mrf.mxu0 }
 0x15e   : > { %v1186_v43 = vadd.f32 %v2449_v38, %v2337_v35 }
 0x15f   : > { %v2451_v46 = vpop.f32.mrf.mxu1  ;;  %v2363_v63 = vpop.f32.mrf.mxu0 }
 0x160   : > { %v1401_v47 = vpack.c.bf16 %v1186_v43, %v1183_v41  ;;  %v2452_v52 = vadd.f32 %v2451_v46, %v2450_v40  ;;  %v2358_v43 = vadd.f32 %v2357_v44, %v2356_v39 }
 0x161   : > { %v2453_v49 = vpop.f32.mrf.mxu1  ;;  %v2365_v5 = vpop.f32.mrf.mxu0 }
 0x162   : > { %2575 = vmatmul.mubr.bf16.vlgmr.msra.gmra.mxu0 %v1401_v47  ;;  %v1191_v61 = vadd.f32 %v2452_v52, %v2340_v51  ;;  %v2361_v47 = vadd.f32 %v2360_v54, %v2359_v48 }
 0x163   : > { %v2454_v56 = vpop.f32.mrf.mxu1  ;;  %v2366_v2 = vpop.f32.mrf.mxu0 }
 0x164   : > { %v2455_v57 = vadd.f32 %v2454_v56, %v2453_v49 }
 0x165   : > { %v2456_v59 = vpop.f32.mrf.mxu1  ;;  %v2368_v7 = vpop.f32.mrf.mxu0 }
 0x166   : > { %v1194_v62 = vadd.f32 %v2455_v57, %v2343_v53 }
 0x167   : > { %v2457_v0 = vpop.f32.mrf.mxu1  ;;  %v2369_v20 = vpop.f32.mrf.mxu0 }
 0x168   : > { %v1402_v3 = vpack.c.bf16 %v1194_v62, %v1191_v61  ;;  %v2458_v13 = vadd.f32 %v2457_v0, %v2456_v59  ;;  %v2364_v61 = vadd.f32 %v2363_v63, %v2362_v58  ;;  %v2367_v0 = vadd.f32 %v2366_v2, %v2365_v5 }
 0x169   : > { %v2459_v8 = vpop.f32.mrf.mxu1  ;;  %v2371_v25 = vpop.f32.mrf.mxu0 }
 0x16a   : > { %2578 = vmatprep.mubr.bf16.mxu0 %v1402_v3  ;;  %v1199_v18 = vadd.f32 %v2458_v13, %v2346_v10 }
 0x16b   : > { %v2460_v4 = vpop.f32.mrf.mxu1  ;;  %v2372_v12 = vpop.f32.mrf.mxu0 }
 0x16c   : > { %v2461_v17 = vadd.f32 %v2460_v4, %v2459_v8 }
 0x16d   : > { %v2462_v9 = vpop.f32.mrf.mxu1  ;;  %v2374_v16 = vpop.f32.mrf.mxu0 }
 0x16e   : > { %v1202_v19 = vadd.f32 %v2461_v17, %v2349_v15  ;;  %v2370_v17 = vadd.f32 %v2369_v20, %v2368_v7 }
 0x16f   : > { %v2463_v22 = vpop.f32.mrf.mxu1  ;;  %v2375_v35 = vpop.f32.mrf.mxu0 }
 0x170   : > { %v1403_v23 = vpack.c.bf16 %v1202_v19, %v1199_v18  ;;  %v2464_v29 = vadd.f32 %v2463_v22, %v2462_v9  ;;  %v2373_v18 = vadd.f32 %v2372_v12, %v2371_v25 }
 0x171   : > { %v2465_v26 = vpop.f32.mrf.mxu1  ;;  %v2377_v40 = vpop.f32.mrf.mxu0 }
 0x172   : > { %2579 = vmatmul.mubr.bf16.gmra.mxu0 %v1403_v23  ;;  %v1207_v33 = vadd.f32 %v2464_v29, %v2352_v27 }
 0x173   : > { %v2466_v14 = vpop.f32.mrf.mxu1  ;;  %v2378_v24 = vpop.f32.mrf.mxu0 }
 0x174   : > { %v2467_v32 = vadd.f32 %v2466_v14, %v2465_v26 }
 0x175   : > { %v2468_v21 = vpop.f32.mrf.mxu1  ;;  %v2380_v31 = vpop.f32.mrf.mxu0 }
 0x176   : > { %v1210_v34 = vadd.f32 %v2467_v32, %v2355_v30  ;;  %v2376_v30 = vadd.f32 %v2375_v35, %v2374_v16  ;;  %v2379_v32 = vadd.f32 %v2378_v24, %v2377_v40 }
 0x177   : > { %v2469_v37 = vpop.f32.mrf.mxu1  ;;  %v2381_v56 = vpop.f32.mrf.mxu0 }
 0x178   : > { %v1404_v38 = vpack.c.bf16 %v1210_v34, %v1207_v33  ;;  %v2470_v46 = vadd.f32 %v2469_v37, %v2468_v21 }
 0x179   : > { %v2471_v41 = vpop.f32.mrf.mxu1  ;;  %v2383_v39 = vpop.f32.mrf.mxu0 }
 0x17a   : > { %2582 = vmatprep.mubr.bf16.mxu0 %v1404_v38  ;;  %v1215_v51 = vadd.f32 %v2470_v46, %v2358_v43  ;;  %v2382_v43 = vadd.f32 %v2381_v56, %v2380_v31 }
 0x17b   : > { %v2472_v28 = vpop.f32.mrf.mxu1  ;;  %v2384_v13 = vpop.f32.mrf.mxu0 }
 0x17c   : > { %v2473_v49 = vadd.f32 %v2472_v28, %v2471_v41 }
 0x17d   : > { %v2474_v36 = vpop.f32.mrf.mxu1  ;;  %v2386_v22 = vpop.f32.mrf.mxu0 }
 0x17e   : > { %v1218_v52 = vadd.f32 %v2473_v49, %v2361_v47  ;;  %v2385_v47 = vadd.f32 %v2384_v13, %v2383_v39 }
 0x17f   : > { %v2475_v53 = vpop.f32.mrf.mxu1  ;;  %v2387_v26 = vpop.f32.mrf.mxu0 }
 0x180   : > { %v1405_v57 = vpack.c.bf16 %v1218_v52, %v1215_v51  ;;  %v2476_v62 = vadd.f32 %v2475_v53, %v2474_v36 }
 0x181   : > { %v2477_v59 = vpop.f32.mrf.mxu1  ;;  %v2389_v33 = vpop.f32.mrf.mxu0 }
 0x182   : > { %2583 = vmatmul.mubr.bf16.gmra.mxu0 %v1405_v57  ;;  %v1223_v48 = vadd.f32 %v2476_v62, %v2364_v61  ;;  %v2388_v57 = vadd.f32 %v2387_v26, %v2386_v22 }
 0x183   : > { %v2478_v3 = vpop.f32.mrf.mxu1  ;;  %v2390_v37 = vpop.f32.mrf.mxu0 }
 0x184   : > { %v2479_v44 = vadd.f32 %v2478_v3, %v2477_v59  ;;  %v2391_v61 = vadd.f32 %v2390_v37, %v2389_v33 }
 0x185   : > { %v2480_v8 = vpop.f32.mrf.mxu1  ;;  %v2392_v49 = vpop.f32.mrf.mxu0 }
 0x186   : > { %v1226_v54 = vadd.f32 %v2479_v44, %v2367_v0 }
 0x187   : > { %v2481_v10 = vpop.f32.mrf.mxu1  ;;  %v2393_v51 = vpop.f32.mrf.mxu0 }
 0x188   : > { %v1406_v15 = vpack.c.bf16 %v1226_v54, %v1223_v48  ;;  %v2482_v9 = vadd.f32 %v2481_v10, %v2480_v8  ;;  %v2394_v10 = vadd.f32 %v2393_v51, %v2392_v49 }
 0x189   : > { %v2483_v4 = vpop.f32.mrf.mxu1  ;;  %v2395_v0 = vpop.f32.mrf.mxu0 }
 0x18a   : > { %2586 = vmatprep.mubr.bf16.mxu0 %v1406_v15  ;;  %v1231_v23 = vadd.f32 %v2482_v9, %v2370_v17 }
 0x18b   : > { %v2484_v19 = vpop.f32.mrf.mxu1  ;;  %v2396_v8 = vpop.f32.mrf.mxu0 }
 0x18c   : > { %v2485_v58 = vadd.f32 %v2484_v19, %v2483_v4  ;;  %v2397_v15 = vadd.f32 %v2396_v8, %v2395_v0 }
 0x18d   : > { %v2486_v63 = vpop.f32.mrf.mxu1 }
 0x18e   : > { %v1234_v5 = vadd.f32 %v2485_v58, %v2373_v18 }
 0x18f   : > { %v2487_v2 = vpop.f32.mrf.mxu1 }
 0x190   : > { %v1407_v27 = vpack.c.bf16 %v1234_v5, %v1231_v23  ;;  %v2488_v14 = vadd.f32 %v2487_v2, %v2486_v63 }
 0x191   : > { %v2489_v29 = vpop.f32.mrf.mxu1 }
 0x192   : > { %2587 = vmatmul.mubr.bf16.gmra.mxu0 %v1407_v27  ;;  %v1239_v34 = vadd.f32 %v2488_v14, %v2376_v30 }
 0x193   : > { %v2490_v21 = vpop.f32.mrf.mxu1 }
 0x194   : > { %v2491_v7 = vadd.f32 %v2490_v21, %v2489_v29 }
 0x195   : > { %v2492_v20 = vpop.f32.mrf.mxu1 }
 0x196   : > { %v1242_v25 = vadd.f32 %v2491_v7, %v2379_v32 }
 0x197   : > { %v2493_v12 = vpop.f32.mrf.mxu1 }
 0x198   : > { %v1408_v38 = vpack.c.bf16 %v1242_v25, %v1239_v34  ;;  %v2494_v46 = vadd.f32 %v2493_v12, %v2492_v20 }
 0x199   : > { %v2495_v41 = vpop.f32.mrf.mxu1 }
 0x19a   : > { %2590 = vmatprep.mubr.bf16.mxu0 %v1408_v38  ;;  %v1247_v36 = vadd.f32 %v2494_v46, %v2382_v43 }
 0x19b   : > { %v2496_v28 = vpop.f32.mrf.mxu1 }
 0x19c   : > { %v2497_v16 = vadd.f32 %v2496_v28, %v2495_v41 }
 0x19d   : > { %v2498_v35 = vpop.f32.mrf.mxu1 }
 0x19e   : > { %v1250_v40 = vadd.f32 %v2497_v16, %v2385_v47 }
 0x19f   : > { %v2499_v24 = vpop.f32.mrf.mxu1 }
 0x1a0   : > { %v1409_v52 = vpack.c.bf16 %v1250_v40, %v1247_v36  ;;  %v2500_v59 = vadd.f32 %v2499_v24, %v2498_v35 }
 0x1a1   : > { %v2501_v53 = vpop.f32.mrf.mxu1 }
 0x1a2   : > { %2591 = vmatmul.mubr.bf16.gmra.mxu0 %v1409_v52  ;;  %v1255_v3 = vadd.f32 %v2500_v59, %v2388_v57 }
 0x1a3   : > { %v2502_v62 = vpop.f32.mrf.mxu1 }
 0x1a4   : > { %v2503_v31 = vadd.f32 %v2502_v62, %v2501_v53 }
 0x1a5   : > { %v2504_v56 = vpop.f32.mrf.mxu1 }
 0x1a6   : > { %v1258_v39 = vadd.f32 %v2503_v31, %v2391_v61 }
 0x1a7   : > { %v2505_v44 = vpop.f32.mrf.mxu1 }
 0x1a8   : > { %v1410_v48 = vpack.c.bf16 %v1258_v39, %v1255_v3  ;;  %v2506_v13 = vadd.f32 %v2505_v44, %v2504_v56 }
 0x1a9   : > { %v2507_v54 = vpop.f32.mrf.mxu1 }
 0x1aa   : > { %2594 = vmatprep.mubr.bf16.mxu0 %v1410_v48  ;;  %v1263_v18 = vadd.f32 %v2506_v13, %v2394_v10 }
 0x1ab   : > { %v2508_v4 = vpop.f32.mrf.mxu1 }
 0x1ac   : > { %v2509_v17 = vadd.f32 %v2508_v4, %v2507_v54 }
 0x1ad   : > { %v2510_v9 = vpop.f32.mrf.mxu1 }
 0x1ae   : > { %v1266_v19 = vadd.f32 %v2509_v17, %v2397_v15 }
 0x1af   : > { %v2511_v22 = vpop.f32.mrf.mxu1 }
 0x1b0   : > { %v1411_v58 = vpack.c.bf16 %v1266_v19, %v1263_v18  ;;  %v2512_v23 = vadd.f32 %v2511_v22, %v2510_v9 }
 0x1b1   : > { %v2513_v63 = vpop.f32.mrf.mxu1 }
 0x1b2   : > { %2595 = vmatmul.mubr.bf16.gmra.mxu0 %v1411_v58  ;;  %v1271_v27 = vadd.f32 %v2512_v23, %v3248_v42 }
 0x1b3   : > { %v2514_v5 = vpop.f32.mrf.mxu1 }
 0x1b4   : > { %v2515_v2 = vadd.f32 %v2514_v5, %v2513_v63 }
 0x1b5   : > { %v2516_v26 = vpop.f32.mrf.mxu1 }
 0x1b6   : > { %v1274_v29 = vadd.f32 %v2515_v2, %v3250_v45 }
 0x1b7   : > { %v2517_v30 = vpop.f32.mrf.mxu1 }
 0x1b8   : > { %v1412_v14 = vpack.c.bf16 %v1274_v29, %v1271_v27  ;;  %v2518_v21 = vadd.f32 %v2517_v30, %v2516_v26 }
 0x1b9   : > { %v2519_v32 = vpop.f32.mrf.mxu1 }
 0x1ba   : > { %2598 = vmatprep.mubr.bf16.mxu0 %v1412_v14  ;;  %v1279_v34 = vadd.f32 %v2518_v21, %v3252_v50 }
 0x1bb   : > { %v2520_v33 = vpop.f32.mrf.mxu1 }
 0x1bc   : > { %v2521_v7 = vadd.f32 %v2520_v33, %v2519_v32 }
 0x1bd   : > { %v2522_v20 = vpop.f32.mrf.mxu1 }
 0x1be   : > { %v1282_v25 = vadd.f32 %v2521_v7, %v3254_v55 }
 0x1bf   : > { %v2523_v12 = vpop.f32.mrf.mxu1 }
 0x1c0   : > { %v1413_v37 = vpack.c.bf16 %v1282_v25, %v1279_v34  ;;  %v2524_v41 = vadd.f32 %v2523_v12, %v2522_v20 }
 0x1c1   : > { %v2525_v38 = vpop.f32.mrf.mxu1 }
 0x1c2   : > { %2599 = vmatmul.mubr.bf16.gmra.mxu0 %v1413_v37  ;;  %v1287_v46 = vadd.f32 %v2524_v41, %v3256_v60  ;;  %v3275_v60 = vld [vmem:[%s3386_s3] ss:$0 sm:$0xff] }
 0x1c3   : > { %v2526_v42 = vpop.f32.mrf.mxu1 }
 0x1c4   : > { %v2527_v43 = vadd.f32 %v2526_v42, %v2525_v38 }
 0x1c5   : > { %v2528_v45 = vpop.f32.mrf.mxu1 }
 0x1c6   : > { %v1290_v47 = vadd.f32 %v2527_v43, %v3258_v1 }
 0x1c7   : > { %v2529_v28 = vpop.f32.mrf.mxu1 }
 0x1c8   : > { %v1414_v49 = vpack.c.bf16 %v1290_v47, %v1287_v46  ;;  %v2530_v35 = vadd.f32 %v2529_v28, %v2528_v45 }
 0x1c9   : > { %v2531_v16 = vpop.f32.mrf.mxu1 }
 0x1ca   : > { %2602 = vmatprep.mubr.bf16.mxu0 %v1414_v49  ;;  %v1295_v36 = vadd.f32 %v2530_v35, %v3260_v6 }
 0x1cb   : > { %v2532_v50 = vpop.f32.mrf.mxu1 }
 0x1cc   : > { %v2533_v55 = vadd.f32 %v2532_v50, %v2531_v16 }
 0x1ce   : > { %v1298_v40 = vadd.f32 %v2533_v55, %v3262_v11 }
 0x1d0   : > { %v1415_v24 = vpack.c.bf16 %v1298_v40, %v1295_v36 }
 0x1d2   : > { %2603 = vmatmul.mubr.bf16.gmra.mxu0 %v1415_v24 }
 0x222   : > { %v2576_v1 = vpop.f32.mrf.mxu0 }
 0x223   : > { %v1530_v51 = vadd.f32 %v2576_v1, %v3275_v60 }
 0x224   : > { %v1521_v52 = vpop.f32.mrf.mxu0 }
 0x225   : > { %v1522_v53 = vadd.f32 %v3275_v60, %v1521_v52  ;;  %v1682_v59 = vmul.f32 0.01, %v1530_v51  ;;  %vm1650_vm0 = vcmp.gt.f32.partialorder %v1530_v51, 0.0 }
 0x226   : > { %v2577_v57 = vpop.f32.mrf.mxu0 }
 0x227   : > { %v1533_v61 = vadd.f32 %v2577_v57, %v3275_v60  ;;  %v1680_v11 = vmul.f32 0.01, %v1522_v53  ;;  %vm1648_vm2 = vcmp.gt.f32.partialorder %v1522_v53, 0.0  ;;  %v1714_v31 = vsel %vm1650_vm0, %v1530_v51, %v1682_v59 }
 0x228   : > { %v1524_v6 = vpop.f32.mrf.mxu0 }
 0x229   : > { %vm1651_vm1 = vcmp.gt.f32.partialorder %v1533_v61, 0.0  ;;  %v1683_v62 = vmul.f32 0.01, %v1533_v61  ;;  %v1525_v0 = vadd.f32 %v3275_v60, %v1524_v6  ;;  %v1712_v44 = vsel %vm1648_vm2, %v1522_v53, %v1680_v11 }
 0x22b   : > { %v1715_v56 = vsel %vm1651_vm1, %v1533_v61, %v1683_v62  ;;  %vm1649_vm3 = vcmp.gt.f32.partialorder %v1525_v0, 0.0  ;;  %v1681_v3 = vmul.f32 0.01, %v1525_v0 }
 0x22c   : > { %v2223_v39 = vpack.c.bf16 %v1715_v56, %v1714_v31 }
 0x22d   : > { %v1713_v8 = vsel %vm1649_vm3, %v1525_v0, %v1681_v3 }
 0x22e   : > { %2295 = vst [vmem:[%s3282_s10 + $0x8] sm:$0xff] %v2223_v39   ;;  %v2218_v48 = vpack.c.bf16 %v1713_v8, %v1712_v44 }
 0x230   : > { %2219 = vst [vmem:[%s3282_s10] sm:$0xff] %v2218_v48  }
 0x232   : > { %v2580_v54 = vpop.f32.mrf.mxu0 }
 0x233   : > { %v1546_v10 = vadd.f32 %v2580_v54, %v3275_v60 }
 0x234   : > { %v1537_v13 = vpop.f32.mrf.mxu0 }
 0x235   : > { %v1538_v15 = vadd.f32 %v3275_v60, %v1537_v13  ;;  %v1686_v17 = vmul.f32 0.01, %v1546_v10  ;;  %vm1654_vm4 = vcmp.gt.f32.partialorder %v1546_v10, 0.0 }
 0x236   : > { %v2581_v4 = vpop.f32.mrf.mxu0 }
 0x237   : > { %v1549_v9 = vadd.f32 %v2581_v4, %v3275_v60  ;;  %v1684_v19 = vmul.f32 0.01, %v1538_v15  ;;  %vm1652_vm6 = vcmp.gt.f32.partialorder %v1538_v15, 0.0  ;;  %v1718_v63 = vsel %vm1654_vm4, %v1546_v10, %v1686_v17 }
 0x238   : > { %v1540_v18 = vpop.f32.mrf.mxu0 }
 0x239   : > { %vm1655_vm5 = vcmp.gt.f32.partialorder %v1549_v9, 0.0  ;;  %v1687_v22 = vmul.f32 0.01, %v1549_v9  ;;  %v1541_v58 = vadd.f32 %v3275_v60, %v1540_v18  ;;  %v1716_v26 = vsel %vm1652_vm6, %v1538_v15, %v1684_v19 }
 0x23b   : > { %v1719_v23 = vsel %vm1655_vm5, %v1549_v9, %v1687_v22  ;;  %vm1653_vm7 = vcmp.gt.f32.partialorder %v1541_v58, 0.0  ;;  %v1685_v5 = vmul.f32 0.01, %v1541_v58 }
 0x23c   : > { %v2233_v2 = vpack.c.bf16 %v1719_v23, %v1718_v63 }
 0x23d   : > { %v1717_v27 = vsel %vm1653_vm7, %v1541_v58, %v1685_v5 }
 0x23e   : > { %2297 = vst [vmem:[%s3282_s10 + $0x18] sm:$0xff] %v2233_v2   ;;  %v2228_v29 = vpack.c.bf16 %v1717_v27, %v1716_v26 }
 0x240   : > { %2296 = vst [vmem:[%s3282_s10 + $0x10] sm:$0xff] %v2228_v29  }
 0x242   : > { %v2584_v30 = vpop.f32.mrf.mxu0 }
 0x243   : > { %v1562_v14 = vadd.f32 %v2584_v30, %v3275_v60 }
 0x244   : > { %v1553_v32 = vpop.f32.mrf.mxu0 }
 0x245   : > { %v1554_v21 = vadd.f32 %v3275_v60, %v1553_v32  ;;  %v1690_v7 = vmul.f32 0.01, %v1562_v14  ;;  %vm1658_vm8 = vcmp.gt.f32.partialorder %v1562_v14, 0.0 }
 0x246   : > { %v2585_v33 = vpop.f32.mrf.mxu0 }
 0x247   : > { %v1565_v20 = vadd.f32 %v2585_v33, %v3275_v60  ;;  %v1688_v25 = vmul.f32 0.01, %v1554_v21  ;;  %vm1656_vm10 = vcmp.gt.f32.partialorder %v1554_v21, 0.0  ;;  %v1722_v38 = vsel %vm1658_vm8, %v1562_v14, %v1690_v7 }
 0x248   : > { %v1556_v34 = vpop.f32.mrf.mxu0 }
 0x249   : > { %vm1659_vm9 = vcmp.gt.f32.partialorder %v1565_v20, 0.0  ;;  %v1691_v12 = vmul.f32 0.01, %v1565_v20  ;;  %v1557_v37 = vadd.f32 %v3275_v60, %v1556_v34  ;;  %v1720_v45 = vsel %vm1656_vm10, %v1554_v21, %v1688_v25 }
 0x24b   : > { %v1723_v41 = vsel %vm1659_vm9, %v1565_v20, %v1691_v12  ;;  %vm1657_vm11 = vcmp.gt.f32.partialorder %v1557_v37, 0.0  ;;  %v1689_v42 = vmul.f32 0.01, %v1557_v37 }
 0x24c   : > { %v2243_v43 = vpack.c.bf16 %v1723_v41, %v1722_v38 }
 0x24d   : > { %v1721_v46 = vsel %vm1657_vm11, %v1557_v37, %v1689_v42 }
 0x24e   : > { %2299 = vst [vmem:[%s3282_s10 + $0x28] sm:$0xff] %v2243_v43   ;;  %v2238_v47 = vpack.c.bf16 %v1721_v46, %v1720_v45 }
 0x250   : > { %2298 = vst [vmem:[%s3282_s10 + $0x20] sm:$0xff] %v2238_v47  }
 0x252   : > { %v2588_v28 = vpop.f32.mrf.mxu0 }
 0x253   : > { %v1578_v49 = vadd.f32 %v2588_v28, %v3275_v60 }
 0x254   : > { %v1569_v16 = vpop.f32.mrf.mxu0 }
 0x255   : > { %v1570_v35 = vadd.f32 %v3275_v60, %v1569_v16  ;;  %v1694_v55 = vmul.f32 0.01, %v1578_v49  ;;  %vm1662_vm12 = vcmp.gt.f32.partialorder %v1578_v49, 0.0 }
 0x256   : > { %v2589_v50 = vpop.f32.mrf.mxu0 }
 0x257   : > { %v1581_v36 = vadd.f32 %v2589_v50, %v3275_v60  ;;  %v1692_v24 = vmul.f32 0.01, %v1570_v35  ;;  %vm1660_vm14 = vcmp.gt.f32.partialorder %v1570_v35, 0.0  ;;  %v1726_v52 = vsel %vm1662_vm12, %v1578_v49, %v1694_v55 }
 0x258   : > { %v1572_v40 = vpop.f32.mrf.mxu0 }
 0x259   : > { %vm1663_vm13 = vcmp.gt.f32.partialorder %v1581_v36, 0.0  ;;  %v1695_v1 = vmul.f32 0.01, %v1581_v36  ;;  %v1573_v51 = vadd.f32 %v3275_v60, %v1572_v40  ;;  %v1724_v61 = vsel %vm1660_vm14, %v1570_v35, %v1692_v24 }
 0x25b   : > { %v1727_v53 = vsel %vm1663_vm13, %v1581_v36, %v1695_v1  ;;  %vm1661_vm15 = vcmp.gt.f32.partialorder %v1573_v51, 0.0  ;;  %v1693_v57 = vmul.f32 0.01, %v1573_v51 }
 0x25c   : > { %v2253_v59 = vpack.c.bf16 %v1727_v53, %v1726_v52 }
 0x25d   : > { %v1725_v6 = vsel %vm1661_vm15, %v1573_v51, %v1693_v57 }
 0x25e   : > { %2301 = vst [vmem:[%s3282_s10 + $0x38] sm:$0xff] %v2253_v59   ;;  %v2248_v11 = vpack.c.bf16 %v1725_v6, %v1724_v61 }
 0x260   : > { %2300 = vst [vmem:[%s3282_s10 + $0x30] sm:$0xff] %v2248_v11  }
 0x262   : > { %v2592_v62 = vpop.f32.mrf.mxu0 }
 0x263   : > { %v1594_v0 = vadd.f32 %v2592_v62, %v3275_v60 }
 0x264   : > { %v1585_v31 = vpop.f32.mrf.mxu0 }
 0x265   : > { %v1586_v56 = vadd.f32 %v3275_v60, %v1585_v31  ;;  %v1698_v39 = vmul.f32 0.01, %v1594_v0  ;;  %vm1666_vm0 = vcmp.gt.f32.partialorder %v1594_v0, 0.0 }
 0x266   : > { %v2593_v3 = vpop.f32.mrf.mxu0 }
 0x267   : > { %v1597_v44 = vadd.f32 %v2593_v3, %v3275_v60  ;;  %v1696_v48 = vmul.f32 0.01, %v1586_v56  ;;  %vm1664_vm2 = vcmp.gt.f32.partialorder %v1586_v56, 0.0  ;;  %v1730_v13 = vsel %vm1666_vm0, %v1594_v0, %v1698_v39 }
 0x268   : > { %v1588_v8 = vpop.f32.mrf.mxu0 }
 0x269   : > { %vm1667_vm1 = vcmp.gt.f32.partialorder %v1597_v44, 0.0  ;;  %v1699_v54 = vmul.f32 0.01, %v1597_v44  ;;  %v1589_v10 = vadd.f32 %v3275_v60, %v1588_v8  ;;  %v1728_v9 = vsel %vm1664_vm2, %v1586_v56, %v1696_v48 }
 0x26b   : > { %v1731_v15 = vsel %vm1667_vm1, %v1597_v44, %v1699_v54  ;;  %vm1665_vm3 = vcmp.gt.f32.partialorder %v1589_v10, 0.0  ;;  %v1697_v4 = vmul.f32 0.01, %v1589_v10 }
 0x26c   : > { %v2263_v17 = vpack.c.bf16 %v1731_v15, %v1730_v13 }
 0x26d   : > { %v1729_v18 = vsel %vm1665_vm3, %v1589_v10, %v1697_v4 }
 0x26e   : > { %2303 = vst [vmem:[%s3282_s10 + $0x48] sm:$0xff] %v2263_v17   ;;  %v2258_v19 = vpack.c.bf16 %v1729_v18, %v1728_v9 }
 0x270   : > { %2302 = vst [vmem:[%s3282_s10 + $0x40] sm:$0xff] %v2258_v19  }
 0x272   : > { %v2596_v22 = vpop.f32.mrf.mxu0 }
 0x273   : > { %v1610_v58 = vadd.f32 %v2596_v22, %v3275_v60 }
 0x274   : > { %v1601_v63 = vpop.f32.mrf.mxu0 }
 0x275   : > { %v1602_v23 = vadd.f32 %v3275_v60, %v1601_v63  ;;  %v1702_v2 = vmul.f32 0.01, %v1610_v58  ;;  %vm1670_vm4 = vcmp.gt.f32.partialorder %v1610_v58, 0.0 }
 0x276   : > { %v2597_v5 = vpop.f32.mrf.mxu0 }
 0x277   : > { %v1613_v26 = vadd.f32 %v2597_v5, %v3275_v60  ;;  %v1700_v29 = vmul.f32 0.01, %v1602_v23  ;;  %vm1668_vm6 = vcmp.gt.f32.partialorder %v1602_v23, 0.0  ;;  %v1734_v32 = vsel %vm1670_vm4, %v1610_v58, %v1702_v2 }
 0x278   : > { %v1604_v27 = vpop.f32.mrf.mxu0 }
 0x279   : > { %vm1671_vm5 = vcmp.gt.f32.partialorder %v1613_v26, 0.0  ;;  %v1703_v30 = vmul.f32 0.01, %v1613_v26  ;;  %v1605_v14 = vadd.f32 %v3275_v60, %v1604_v27  ;;  %v1732_v20 = vsel %vm1668_vm6, %v1602_v23, %v1700_v29 }
 0x27b   : > { %v1735_v21 = vsel %vm1671_vm5, %v1613_v26, %v1703_v30  ;;  %vm1669_vm7 = vcmp.gt.f32.partialorder %v1605_v14, 0.0  ;;  %v1701_v33 = vmul.f32 0.01, %v1605_v14 }
 0x27c   : > { %v2273_v7 = vpack.c.bf16 %v1735_v21, %v1734_v32 }
 0x27d   : > { %v1733_v34 = vsel %vm1669_vm7, %v1605_v14, %v1701_v33 }
 0x27e   : > { %2305 = vst [vmem:[%s3282_s10 + $0x58] sm:$0xff] %v2273_v7   ;;  %v2268_v25 = vpack.c.bf16 %v1733_v34, %v1732_v20 }
 0x280   : > { %2304 = vst [vmem:[%s3282_s10 + $0x50] sm:$0xff] %v2268_v25  }
 0x282   : > { %v2600_v12 = vpop.f32.mrf.mxu0 }
 0x283   : > { %v1626_v37 = vadd.f32 %v2600_v12, %v3275_v60 }
 0x284   : > { %v1617_v38 = vpop.f32.mrf.mxu0 }
 0x285   : > { %v1618_v41 = vadd.f32 %v3275_v60, %v1617_v38  ;;  %v1706_v43 = vmul.f32 0.01, %v1626_v37  ;;  %vm1674_vm8 = vcmp.gt.f32.partialorder %v1626_v37, 0.0 }
 0x286   : > { %v2601_v42 = vpop.f32.mrf.mxu0 }
 0x287   : > { %v1629_v45 = vadd.f32 %v2601_v42, %v3275_v60  ;;  %v1704_v47 = vmul.f32 0.01, %v1618_v41  ;;  %vm1672_vm10 = vcmp.gt.f32.partialorder %v1618_v41, 0.0  ;;  %v1738_v16 = vsel %vm1674_vm8, %v1626_v37, %v1706_v43 }
 0x288   : > { %v1620_v46 = vpop.f32.mrf.mxu0 }
 0x289   : > { %vm1675_vm9 = vcmp.gt.f32.partialorder %v1629_v45, 0.0  ;;  %v1707_v28 = vmul.f32 0.01, %v1629_v45  ;;  %v1621_v49 = vadd.f32 %v3275_v60, %v1620_v46  ;;  %v1736_v36 = vsel %vm1672_vm10, %v1618_v41, %v1704_v47 }
 0x28b   : > { %v1739_v35 = vsel %vm1675_vm9, %v1629_v45, %v1707_v28  ;;  %vm1673_vm11 = vcmp.gt.f32.partialorder %v1621_v49, 0.0  ;;  %v1705_v50 = vmul.f32 0.01, %v1621_v49 }
 0x28c   : > { %v2283_v55 = vpack.c.bf16 %v1739_v35, %v1738_v16 }
 0x28d   : > { %v1737_v40 = vsel %vm1673_vm11, %v1621_v49, %v1705_v50 }
 0x28e   : > { %2307 = vst [vmem:[%s3282_s10 + $0x68] sm:$0xff] %v2283_v55   ;;  %v2278_v24 = vpack.c.bf16 %v1737_v40, %v1736_v36 }
 0x290   : > { %2306 = vst [vmem:[%s3282_s10 + $0x60] sm:$0xff] %v2278_v24  }
 0x292   : > { %v2604_v1 = vpop.f32.mrf.mxu0 }
 0x293   : > { %v1642_v51 = vadd.f32 %v2604_v1, %v3275_v60 }
 0x294   : > { %v1633_v52 = vpop.f32.mrf.mxu0 }
 0x295   : > { %v1634_v53 = vadd.f32 %v3275_v60, %v1633_v52  ;;  %v1710_v59 = vmul.f32 0.01, %v1642_v51  ;;  %vm1678_vm12 = vcmp.gt.f32.partialorder %v1642_v51, 0.0 }
 0x296   : > { %v2605_v57 = vpop.f32.mrf.mxu0 }
 0x297   : > { %v1645_v61 = vadd.f32 %v2605_v57, %v3275_v60  ;;  %v1708_v11 = vmul.f32 0.01, %v1634_v53  ;;  %vm1676_vm14 = vcmp.gt.f32.partialorder %v1634_v53, 0.0  ;;  %v1742_v31 = vsel %vm1678_vm12, %v1642_v51, %v1710_v59 }
 0x298   : > { %v1636_v6 = vpop.f32.mrf.mxu0 }
 0x299   : > { %vm1679_vm13 = vcmp.gt.f32.partialorder %v1645_v61, 0.0  ;;  %v1711_v62 = vmul.f32 0.01, %v1645_v61  ;;  %v1637_v0 = vadd.f32 %v3275_v60, %v1636_v6  ;;  %v1740_v44 = vsel %vm1676_vm14, %v1634_v53, %v1708_v11 }
 0x29b   : > { %v1743_v56 = vsel %vm1679_vm13, %v1645_v61, %v1711_v62  ;;  %vm1677_vm15 = vcmp.gt.f32.partialorder %v1637_v0, 0.0  ;;  %v1709_v3 = vmul.f32 0.01, %v1637_v0 }
 0x29c   : > { %v2293_v39 = vpack.c.bf16 %v1743_v56, %v1742_v31 }
 0x29d   : > { %v1741_v8 = vsel %vm1677_vm15, %v1637_v0, %v1709_v3 }
 0x29e   : > { %2309 = vst [vmem:[%s3282_s10 + $0x78] sm:$0xff] %v2293_v39   ;;  %v2288_v60 = vpack.c.bf16 %v1741_v8, %v1740_v44 }
 0x2a0   : > { %2308 = vst [vmem:[%s3282_s10 + $0x70] sm:$0xff] %v2288_v60  }
 0x2a1   : > { %2940 = shalt.err (!%p2937_p5)
}
 0x2a2   : > { %s2941_s11 = scalar_lea.hbm %s3331_s29, 2048  ;;  %s2945_s25 = scalar_lea.hbm %s3387_s4, 4096 }
 0x2a3   : > { %p2942_p10 = scmp.ne.s32.totalorder %s3331_s29, %s2941_s11  ;;  %p2946_p6 = scmp.lt.s32.totalorder %s3331_s29, %s3387_s4 }
 0x2a4   : > { %p2947_p12 = scmp.lt.s32.totalorder %s2945_s25, %s2941_s11 }
 0x2a5   : > { %p2943_p1 = pnand %p2942_p10, %p3143_p7 }
 0x2a6   : > { %p2948_p3 = por %p2947_p12, %p2946_p6 }
 0x2a7   : > { %p2944_p4 = pneg %p2943_p1 }
 0x2a9   : > { %p2949_p8 = pnand %p2948_p3, %p2944_p4 }
 0x2ab   : > { %2952 = shalt.err (!%p2949_p8)
}
 0x2ac   : > { %s3021_s12 = smov 64   ;;  %s3022_s13 = smov 4  }
 0x2ad   : > { %2632 = dma.vmem_to_hbm [thread:$0]  (%p3143_p7), %s3333_s24, 2048, %s3331_s29, %s1905_s18, %s3021_s12, %s3021_s12, %s3022_s13  }
 0x2ae PF: > { %s1933_s22 = sand.u32 1, %s2991_s15   ;;  %p3401_p9 = scmp.ne.s32.totalorder %s3394_s26, 0 }
 0x2af   : > { %p3402_p11 = scmp.ge.s32.totalorder %s3011_s20, 2  ;;  %s1934_s6 = scalar_lea.sflag [#allocation5], %s1933_s22 }
 0x2b1   : > { %p2646_p2 = pnand %p3402_p11, %p3401_p9 }
 0x2b3   : > { %p2647_p13 = pneg %p2646_p2 }
 0x2b5   : > { %2986 = dma.done.wait (%p2647_p13), %s1934_s6, 2048  }
 0x2b6   : > { %2988 = vsyncadd (%p2647_p13), %s1934_s6, 4294965248  ;;  %s21_s20 = sadd.s32 1, %s3011_s20   ;;  %s3403_s15 = smov %s2995_s16 }
 0x2b7   : > { %p18_p0 = scmp.ge.s32.totalorder %s21_s20, 4   ;;  %s3404_s16 = smov %s2999_s17 }
 0x2b8   : > { %s3405_s17 = smov %s3152_s7  ;;  %s3406_s18 = smov %s3007_s19 }
 0x2b9   : > { %s3407_s19 = smov %s3409_s21  ;;  %20 = sbr.rel (!%p18_p0) target bundleno = 7 (0x7), region = 98 }
 0x2be   :  { %1939 = vsyncpa [#allocation4], 1 }
 0x2bf   :  { %1941 = vsyncpa [#allocation4 + $0x1], 1 }
 0x2c0   :  { %1942 = vsyncpa [#allocation7], 1 }
 0x2c1   :  { %1943 = vsyncpa [#allocation5], 1 }
 0x2c2   :  { %1945 = vsyncpa [#allocation5 + $0x1], 1 }

</bundles_post_ra>
